<compile_context>
chip_gen: v5e
topology: v5e:2x2
jax: 0.10.0
libtpu: 0.0.40
codegen_flags: <defaults>
</compile_context>

<pallas_src>
import jax
import jax.numpy as jnp
from jax.experimental import pallas as pl
from jax.experimental.pallas import tpu as pltpu

EPS = 1e-5
_N_PHASES = 4  # L1+stats1 | BN1+L2+stats2 | BN2+L3+L4-stats | BN4 -> out


def fc_encoder_pallas(x, params, *, tile_b=None, use_bf16_layer1=True):
    """FCEncoder forward.  x: (B, dim_in) f32; params as produced by init_params."""
    w1, b1, bt1, w2, b2, bt2, w3, b3, bt3, w4, b4 = params
    B, d_in = x.shape
    hidden = w1.shape[1]
    nstyle = w4.shape[1]
    n_pad = ((nstyle + 127) // 128) * 128          # lane-dense output width

    # ---- batch tile choice (multiple of 8, as large as reasonable) --------
    if tile_b is None:
        tile_b = B
        for t in (1024, 512, 256, 128, 64, 32, 16, 8):
            if t <= B and B % t == 0:
                tile_b = t
                break
    assert B % tile_b == 0 and tile_b % 8 == 0, "batch must tile into multiples of 8"
    # TODO(synk): ragged batches (B % tile_b != 0) would need masked BN stats.
    nbt = B // tile_b

    # ---- one-time host-side parameter prep (layout plumbing, not compute) --
    in_dtype = jnp.bfloat16 if use_bf16_layer1 else jnp.float32
    xk = x.astype(in_dtype)
    w1k = w1.astype(in_dtype)
    # Pack the six (hidden,) per-channel vectors into one sublane-aligned array:
    # rows 0=b1, 1=(1+beta1), 2=b2, 3=(1+beta2), 4=b3, 5=(1+beta3), 6..7 unused.
    vec = jnp.zeros((8, hidden), jnp.float32)
    vec = vec.at[0].set(b1.reshape(hidden).astype(jnp.float32))
    vec = vec.at[1].set((1.0 + bt1).reshape(hidden).astype(jnp.float32))
    vec = vec.at[2].set(b2.reshape(hidden).astype(jnp.float32))
    vec = vec.at[3].set((1.0 + bt2).reshape(hidden).astype(jnp.float32))
    vec = vec.at[4].set(b3.reshape(hidden).astype(jnp.float32))
    vec = vec.at[5].set((1.0 + bt3).reshape(hidden).astype(jnp.float32))
    w4p = jnp.zeros((hidden, n_pad), jnp.float32).at[:, :nstyle].set(w4)
    b4p = jnp.zeros((1, n_pad), jnp.float32).at[:, :nstyle].set(b4.reshape(1, nstyle))

    inv_b = 1.0 / B
    last = _N_PHASES - 1
    last_x_tile = nbt - 1          # pin x index here after phase 0 -> zero re-fetch

    def kernel(x_ref, w1_ref, vec_ref, w2_ref, w3_ref, w4_ref, b4_ref, o_ref,
               act_ref, s1_ref, q1_ref, s2_ref, q2_ref, s4_ref, q4_ref):
        p = pl.program_id(0)                       # phase (outer, sequential)
        i = pl.program_id(1)                       # batch tile (inner)
        rows = pl.ds(pl.multiple_of(i * tile_b, tile_b), tile_b)

        def linear(h, w_ref, bias):
            return jnp.dot(h, w_ref[...],
                           preferred_element_type=jnp.float32) + bias

        def swish(h, eb):                          # x * sigmoid((1+beta)*x)
            return h * jax.nn.sigmoid(eb * h)

        def accum_stats(h, s_ref, q_ref):          # single-pass sum / sumsq
            @pl.when(i == 0)
            def _():
                s_ref[...] = jnp.zeros_like(s_ref)
                q_ref[...] = jnp.zeros_like(q_ref)
            s_ref[...] += jnp.sum(h, axis=0, keepdims=True)
            q_ref[...] += jnp.sum(h * h, axis=0, keepdims=True)

        def bn_stats(s_ref, q_ref):                # global batch mean / rstd
            m = s_ref[...] * inv_b
            v = jnp.maximum(q_ref[...] * inv_b - m * m, 0.0)
            return m, jax.lax.rsqrt(v + EPS)

        @pl.when(p == 0)
        def _phase0():                             # L1 + Swish, gather BN1 stats
            h = swish(linear(x_ref[...], w1_ref, vec_ref[0:1, :]), vec_ref[1:2, :])
            act_ref[rows, :] = h
            accum_stats(h, s1_ref, q1_ref)

        @pl.when(p == 1)
        def _phase1():                             # BN1 + L2 + Swish, BN2 stats
            m, r = bn_stats(s1_ref, q1_ref)
            h = swish(linear((act_ref[rows, :] - m) * r, w2_ref, vec_ref[2:3, :]),
                      vec_ref[3:4, :])
            act_ref[rows, :] = h
            accum_stats(h, s2_ref, q2_ref)

        @pl.when(p == 2)
        def _phase2():                             # BN2 + L3 + Swish (+L4 stats)
            m, r = bn_stats(s2_ref, q2_ref)
            a = swish(linear((act_ref[rows, :] - m) * r, w3_ref, vec_ref[4:5, :]),
                      vec_ref[5:6, :])
            act_ref[rows, :] = a
            accum_stats(linear(a, w4_ref, b4_ref[...]), s4_ref, q4_ref)

        @pl.when(p == last)
        def _phase3():                             # recompute L4, final BN -> out
            m, r = bn_stats(s4_ref, q4_ref)
            h4 = linear(act_ref[rows, :], w4_ref, b4_ref[...])
            o_ref[...] = ((h4 - m) * r).astype(o_ref.dtype)

    resident = lambda shape: pl.BlockSpec(shape, lambda p, i: (0, 0))
    in_specs = [
        # x only advances during phase 0; afterwards the index is pinned to the
        # last-fetched tile, so the block is never re-fetched.
        pl.BlockSpec((tile_b, d_in),
                     lambda p, i: (jnp.where(p == 0, i, last_x_tile), 0)),
        resident(w1k.shape),            # w1 (bf16 or f32)
        resident(vec.shape),            # packed biases + (1+beta)s
        resident(w2.shape),
        resident(w3.shape),
        resident((hidden, n_pad)),      # w4 padded to 128 lanes
        resident((1, n_pad)),           # b4 padded
    ]
    # Output blocks only advance in the final phase (lane-dense 128-wide stores).
    out_spec = pl.BlockSpec((tile_b, n_pad),
                            lambda p, i: (jnp.where(p == last, i, 0), 0))

    scratch = [
        pltpu.VMEM((B, hidden), jnp.float32),   # activation stash, reused per phase
        pltpu.VMEM((1, hidden), jnp.float32),   # BN1 sum
        pltpu.VMEM((1, hidden), jnp.float32),   # BN1 sumsq
        pltpu.VMEM((1, hidden), jnp.float32),   # BN2 sum
        pltpu.VMEM((1, hidden), jnp.float32),   # BN2 sumsq
        pltpu.VMEM((1, n_pad), jnp.float32),    # BN3 (output) sum
        pltpu.VMEM((1, n_pad), jnp.float32),    # BN3 (output) sumsq
    ]

    out_padded = pl.pallas_call(
        kernel,
        out_shape=jax.ShapeDtypeStruct((B, n_pad), jnp.float32),
        grid=(_N_PHASES, nbt),
        in_specs=in_specs,
        out_specs=out_spec,
        scratch_shapes=scratch,
        compiler_params=pltpu.CompilerParams(
            # Batch axis cannot be "parallel": tiles accumulate shared BN stats.
            dimension_semantics=("arbitrary", "arbitrary"),
            vmem_limit_bytes=32 * 1024 * 1024,
        ),
    )(xk, w1k, vec, w2, w3, w4p, b4p)
    return out_padded[:, :nstyle]


def init_params(key, dim_in=256, hidden=64, nstyle=5):
    """Deterministic synthetic parameters (PyTorch-default-like uniform init)."""
    def lin(k, fan_in, fan_out):
        k1, k2 = jax.random.split(k)
        bound = 1.0 / jnp.sqrt(fan_in)
        w = jax.random.uniform(k1, (fan_in, fan_out), jnp.float32, -bound, bound)
        b = jax.random.uniform(k2, (1, fan_out), jnp.float32, -bound, bound)
        return w, b

    ks = jax.random.split(key, 4)
    w1, b1 = lin(ks[0], dim_in, hidden)
    w2, b2 = lin(ks[1], hidden, hidden)
    w3, b3 = lin(ks[2], hidden, hidden)
    w4, b4 = lin(ks[3], hidden, nstyle)
    # Swish with init=1.0 -> beta = 4*1 - 1 = 3.0 per channel.
    bt = lambda: jnp.full((1, hidden), 3.0, jnp.float32)
    return [w1, b1, bt(), w2, b2, bt(), w3, b3, bt(), w4, b4]


def fc_encoder_ref(x, params, use_bf16_layer1=True):
    """Pure-JAX reference (training-mode BN with batch statistics, eps=1e-5)."""
    w1, b1, bt1, w2, b2, bt2, w3, b3, bt3, w4, b4 = params

    def swish(h, bt):
        return h * jax.nn.sigmoid((1.0 + bt) * h)

    def bn(h):
        m = jnp.mean(h, axis=0, keepdims=True)
        v = jnp.mean((h - m) ** 2, axis=0, keepdims=True)
        return (h - m) / jnp.sqrt(v + EPS)

    if use_bf16_layer1:
        h = jnp.dot(x.astype(jnp.bfloat16), w1.astype(jnp.bfloat16),
                    preferred_element_type=jnp.float32) + b1
    else:
        h = x @ w1 + b1
    h = bn(swish(h, bt1))
    h = bn(swish(h @ w2 + b2, bt2))
    h = swish(h @ w3 + b3, bt3)
    return bn(h @ w4 + b4)


if __name__ == "__main__":
    key = jax.random.PRNGKey(0)
    k_x, k_p = jax.random.split(key)

    B, DIM_IN, HIDDEN, NSTYLE = 64, 256, 64, 5
    x = jax.random.normal(k_x, (B, DIM_IN), dtype=jnp.float32)
    params = init_params(k_p, DIM_IN, HIDDEN, NSTYLE)

    # Exact f32 path (matches the PyTorch module's math); tile_b=16 -> 4 batch
    # tiles, exercising the cross-tile BatchNorm statistics machinery.
    out_f32 = jax.block_until_ready(
        fc_encoder_pallas(x, params, tile_b=16, use_bf16_layer1=False))
    ref_f32 = fc_encoder_ref(x, params, use_bf16_layer1=False)
    assert out_f32.shape == (B, NSTYLE)
    err = float(jnp.max(jnp.abs(out_f32 - ref_f32)))
    assert err < 1e-3, f"f32 path max abs err = {err}"

    # Perf-recommended bf16 layer-1 path, checked against a matched reference.
    out_bf16 = jax.block_until_ready(
        fc_encoder_pallas(x, params, tile_b=16, use_bf16_layer1=True))
    ref_bf16 = fc_encoder_ref(x, params, use_bf16_layer1=True)
    err = float(jnp.max(jnp.abs(out_bf16 - ref_bf16)))
    assert err < 5e-2, f"bf16 path max abs err = {err}"

    print("KERNEL_OK")
</pallas_src>

<mosaic_0001>
module attributes {stable_mosaic.version = 11 : i64} {
  func.func @kernel(%arg0: i32, %arg1: i32, %arg2: memref<16x256xf32, #tpu.memory_space<vmem>>, %arg3: memref<256x64xf32, #tpu.memory_space<vmem>>, %arg4: memref<8x64xf32, #tpu.memory_space<vmem>>, %arg5: memref<64x64xf32, #tpu.memory_space<vmem>>, %arg6: memref<64x64xf32, #tpu.memory_space<vmem>>, %arg7: memref<64x128xf32, #tpu.memory_space<vmem>>, %arg8: memref<1x128xf32, #tpu.memory_space<vmem>>, %arg9: memref<16x128xf32, #tpu.memory_space<vmem>>, %arg10: memref<64x64xf32, #tpu.memory_space<vmem>>, %arg11: memref<1x64xf32, #tpu.memory_space<vmem>>, %arg12: memref<1x64xf32, #tpu.memory_space<vmem>>, %arg13: memref<1x64xf32, #tpu.memory_space<vmem>>, %arg14: memref<1x64xf32, #tpu.memory_space<vmem>>, %arg15: memref<1x128xf32, #tpu.memory_space<vmem>>, %arg16: memref<1x128xf32, #tpu.memory_space<vmem>>) attributes {dimension_semantics = [#tpu.dimension_semantics<arbitrary>, #tpu.dimension_semantics<arbitrary>], iteration_bounds = array<i64: 4, 4>, scalar_prefetch = 0 : i64, scratch_operands = 7 : i64, tpu.core_type = #tpu.core_type<tc>, window_params = [{transform_indices = @transform_0, window_bounds = array<i64: 16, 256>}, {pipeline_mode = #tpu.pipeline_mode<synchronous>, transform_indices = @transform_1, window_bounds = array<i64: 256, 64>}, {pipeline_mode = #tpu.pipeline_mode<synchronous>, transform_indices = @transform_2, window_bounds = array<i64: 8, 64>}, {pipeline_mode = #tpu.pipeline_mode<synchronous>, transform_indices = @transform_3, window_bounds = array<i64: 64, 64>}, {pipeline_mode = #tpu.pipeline_mode<synchronous>, transform_indices = @transform_4, window_bounds = array<i64: 64, 64>}, {pipeline_mode = #tpu.pipeline_mode<synchronous>, transform_indices = @transform_5, window_bounds = array<i64: 64, 128>}, {pipeline_mode = #tpu.pipeline_mode<synchronous>, transform_indices = @transform_6, window_bounds = array<i64: 1, 128>}, {transform_indices = @transform_7, window_bounds = array<i64: 16, 128>}]} {
    %c16_i32 = arith.constant 16 : i32
    %0 = arith.muli %arg1, %c16_i32 : i32
    %1 = tpu.assume_multiple %0, 16 : i32
    %c0_i32 = arith.constant 0 : i32
    %2 = arith.cmpi eq, %arg0, %c0_i32 : i32
    %3 = arith.extui %2 : i1 to i32
    %c0_i32_0 = arith.constant 0 : i32
    %4 = arith.cmpi ne, %3, %c0_i32_0 : i32
    scf.if %4 {
      %c0 = arith.constant 0 : index
      %c0_4 = arith.constant 0 : index
      %14 = vector.load %arg2[%c0, %c0_4] : memref<16x256xf32, #tpu.memory_space<vmem>>, vector<16x256xf32>
      %c0_5 = arith.constant 0 : index
      %c0_6 = arith.constant 0 : index
      %15 = vector.load %arg4[%c0_5, %c0_6] : memref<8x64xf32, #tpu.memory_space<vmem>>, vector<1x64xf32>
      %c0_7 = arith.constant 0 : index
      %c0_8 = arith.constant 0 : index
      %16 = vector.load %arg3[%c0_7, %c0_8] : memref<256x64xf32, #tpu.memory_space<vmem>>, vector<256x64xf32>
      %cst = arith.constant dense<0.000000e+00> : vector<16x64xf32>
      %17 = tpu.matmul %14, %16, %cst {dimension_numbers = #tpu.dot_dimension_numbers<[1], [0], [0], [1], [0, 0, 1, 1], [], []>} : vector<16x256xf32>, vector<256x64xf32>, vector<16x64xf32> -> vector<16x64xf32>
      %18 = vector.broadcast %15 : vector<1x64xf32> to vector<16x64xf32>
      %19 = arith.addf %17, %18 : vector<16x64xf32>
      %c1 = arith.constant 1 : index
      %c0_9 = arith.constant 0 : index
      %20 = vector.load %arg4[%c1, %c0_9] : memref<8x64xf32, #tpu.memory_space<vmem>>, vector<1x64xf32>
      %21 = vector.broadcast %20 : vector<1x64xf32> to vector<16x64xf32>
      %22 = arith.mulf %21, %19 : vector<16x64xf32>
      %23 = arith.negf %22 : vector<16x64xf32>
      %24 = math.exp %23 : vector<16x64xf32>
      %cst_10 = arith.constant 1.000000e+00 : f32
      %25 = vector.broadcast %cst_10 : f32 to vector<16x64xf32>
      %26 = arith.addf %25, %24 : vector<16x64xf32>
      %27 = arith.divf %25, %26 : vector<16x64xf32>
      %28 = arith.mulf %19, %27 : vector<16x64xf32>
      %29 = arith.index_cast %1 : i32 to index
      %c0_11 = arith.constant 0 : index
      %30 = vector.load %arg10[%29, %c0_11] : memref<64x64xf32, #tpu.memory_space<vmem>>, vector<16x64xf32>
      tpu.vector_store %arg10[%29, %c0_11], %28 {strides = array<i32>} : memref<64x64xf32, #tpu.memory_space<vmem>>, vector<16x64xf32>,
      %c0_i32_12 = arith.constant 0 : i32
      %31 = arith.cmpi eq, %arg1, %c0_i32_12 : i32
      %32 = arith.extui %31 : i1 to i32
      %c0_i32_13 = arith.constant 0 : i32
      %33 = arith.cmpi ne, %32, %c0_i32_13 : i32
      scf.if %33 {
        %cst_24 = arith.constant 0.000000e+00 : f32
        %45 = vector.broadcast %cst_24 : f32 to vector<1x64xf32>
        %c0_25 = arith.constant 0 : index
        %c0_26 = arith.constant 0 : index
        %46 = vector.load %arg11[%c0_25, %c0_26] : memref<1x64xf32, #tpu.memory_space<vmem>>, vector<1x64xf32>
        tpu.vector_store %arg11[%c0_25, %c0_26], %45 {strides = array<i32>} : memref<1x64xf32, #tpu.memory_space<vmem>>, vector<1x64xf32>,
        %cst_27 = arith.constant 0.000000e+00 : f32
        %47 = vector.broadcast %cst_27 : f32 to vector<1x64xf32>
        %c0_28 = arith.constant 0 : index
        %c0_29 = arith.constant 0 : index
        %48 = vector.load %arg12[%c0_28, %c0_29] : memref<1x64xf32, #tpu.memory_space<vmem>>, vector<1x64xf32>
        tpu.vector_store %arg12[%c0_28, %c0_29], %47 {strides = array<i32>} : memref<1x64xf32, #tpu.memory_space<vmem>>, vector<1x64xf32>,
      } else {
      }
      %c0_14 = arith.constant 0 : index
      %c0_15 = arith.constant 0 : index
      %34 = vector.load %arg11[%c0_14, %c0_15] : memref<1x64xf32, #tpu.memory_space<vmem>>, vector<1x64xf32>
      %cst_16 = arith.constant dense<0.000000e+00> : vector<64xf32>
      %35 = vector.multi_reduction <add>, %28, %cst_16 [0] : vector<16x64xf32> to vector<64xf32>
      %36 = vector.shape_cast %35 : vector<64xf32> to vector<1x64xf32>
      %37 = arith.addf %34, %36 : vector<1x64xf32>
      %c0_17 = arith.constant 0 : index
      %c0_18 = arith.constant 0 : index
      %38 = vector.load %arg11[%c0_17, %c0_18] : memref<1x64xf32, #tpu.memory_space<vmem>>, vector<1x64xf32>
      tpu.vector_store %arg11[%c0_17, %c0_18], %37 {strides = array<i32>} : memref<1x64xf32, #tpu.memory_space<vmem>>, vector<1x64xf32>,
      %c0_19 = arith.constant 0 : index
      %c0_20 = arith.constant 0 : index
      %39 = vector.load %arg12[%c0_19, %c0_20] : memref<1x64xf32, #tpu.memory_space<vmem>>, vector<1x64xf32>
      %40 = arith.mulf %28, %28 : vector<16x64xf32>
      %cst_21 = arith.constant dense<0.000000e+00> : vector<64xf32>
      %41 = vector.multi_reduction <add>, %40, %cst_21 [0] : vector<16x64xf32> to vector<64xf32>
      %42 = vector.shape_cast %41 : vector<64xf32> to vector<1x64xf32>
      %43 = arith.addf %39, %42 : vector<1x64xf32>
      %c0_22 = arith.constant 0 : index
      %c0_23 = arith.constant 0 : index
      %44 = vector.load %arg12[%c0_22, %c0_23] : memref<1x64xf32, #tpu.memory_space<vmem>>, vector<1x64xf32>
      tpu.vector_store %arg12[%c0_22, %c0_23], %43 {strides = array<i32>} : memref<1x64xf32, #tpu.memory_space<vmem>>, vector<1x64xf32>,
    } else {
    }
    %c1_i32 = arith.constant 1 : i32
    %5 = arith.cmpi eq, %arg0, %c1_i32 : i32
    %6 = arith.extui %5 : i1 to i32
    %c0_i32_1 = arith.constant 0 : i32
    %7 = arith.cmpi ne, %6, %c0_i32_1 : i32
    scf.if %7 {
      %c0 = arith.constant 0 : index
      %c0_4 = arith.constant 0 : index
      %14 = vector.load %arg11[%c0, %c0_4] : memref<1x64xf32, #tpu.memory_space<vmem>>, vector<1x64xf32>
      %cst = arith.constant 1.562500e-02 : f32
      %15 = vector.broadcast %cst : f32 to vector<1x64xf32>
      %16 = arith.mulf %14, %15 : vector<1x64xf32>
      %c0_5 = arith.constant 0 : index
      %c0_6 = arith.constant 0 : index
      %17 = vector.load %arg12[%c0_5, %c0_6] : memref<1x64xf32, #tpu.memory_space<vmem>>, vector<1x64xf32>
      %cst_7 = arith.constant 1.562500e-02 : f32
      %18 = vector.broadcast %cst_7 : f32 to vector<1x64xf32>
      %19 = arith.mulf %17, %18 : vector<1x64xf32>
      %20 = arith.mulf %16, %16 : vector<1x64xf32>
      %21 = arith.subf %19, %20 : vector<1x64xf32>
      %cst_8 = arith.constant 0.000000e+00 : f32
      %22 = vector.broadcast %cst_8 : f32 to vector<1x64xf32>
      %23 = arith.maximumf %21, %22 : vector<1x64xf32>
      %cst_9 = arith.constant 9.99999974E-6 : f32
      %24 = vector.broadcast %cst_9 : f32 to vector<1x64xf32>
      %25 = arith.addf %23, %24 : vector<1x64xf32>
      %26 = math.rsqrt %25 : vector<1x64xf32>
      %27 = arith.index_cast %1 : i32 to index
      %c0_10 = arith.constant 0 : index
      %28 = vector.load %arg10[%27, %c0_10] : memref<64x64xf32, #tpu.memory_space<vmem>>, vector<16x64xf32>
      %29 = vector.broadcast %16 : vector<1x64xf32> to vector<16x64xf32>
      %30 = arith.subf %28, %29 : vector<16x64xf32>
      %31 = vector.broadcast %26 : vector<1x64xf32> to vector<16x64xf32>
      %32 = arith.mulf %30, %31 : vector<16x64xf32>
      %c2 = arith.constant 2 : index
      %c0_11 = arith.constant 0 : index
      %33 = vector.load %arg4[%c2, %c0_11] : memref<8x64xf32, #tpu.memory_space<vmem>>, vector<1x64xf32>
      %c0_12 = arith.constant 0 : index
      %c0_13 = arith.constant 0 : index
      %34 = vector.load %arg5[%c0_12, %c0_13] : memref<64x64xf32, #tpu.memory_space<vmem>>, vector<64x64xf32>
      %cst_14 = arith.constant dense<0.000000e+00> : vector<16x64xf32>
      %35 = tpu.matmul %32, %34, %cst_14 {dimension_numbers = #tpu.dot_dimension_numbers<[1], [0], [0], [1], [0, 0, 1, 1], [], []>} : vector<16x64xf32>, vector<64x64xf32>, vector<16x64xf32> -> vector<16x64xf32>
      %36 = vector.broadcast %33 : vector<1x64xf32> to vector<16x64xf32>
      %37 = arith.addf %35, %36 : vector<16x64xf32>
      %c3 = arith.constant 3 : index
      %c0_15 = arith.constant 0 : index
      %38 = vector.load %arg4[%c3, %c0_15] : memref<8x64xf32, #tpu.memory_space<vmem>>, vector<1x64xf32>
      %39 = vector.broadcast %38 : vector<1x64xf32> to vector<16x64xf32>
      %40 = arith.mulf %39, %37 : vector<16x64xf32>
      %41 = arith.negf %40 : vector<16x64xf32>
      %42 = math.exp %41 : vector<16x64xf32>
      %cst_16 = arith.constant 1.000000e+00 : f32
      %43 = vector.broadcast %cst_16 : f32 to vector<16x64xf32>
      %44 = arith.addf %43, %42 : vector<16x64xf32>
      %45 = arith.divf %43, %44 : vector<16x64xf32>
      %46 = arith.mulf %37, %45 : vector<16x64xf32>
      %47 = arith.index_cast %1 : i32 to index
      %c0_17 = arith.constant 0 : index
      %48 = vector.load %arg10[%47, %c0_17] : memref<64x64xf32, #tpu.memory_space<vmem>>, vector<16x64xf32>
      tpu.vector_store %arg10[%47, %c0_17], %46 {strides = array<i32>} : memref<64x64xf32, #tpu.memory_space<vmem>>, vector<16x64xf32>,
      %c0_i32_18 = arith.constant 0 : i32
      %49 = arith.cmpi eq, %arg1, %c0_i32_18 : i32
      %50 = arith.extui %49 : i1 to i32
      %c0_i32_19 = arith.constant 0 : i32
      %51 = arith.cmpi ne, %50, %c0_i32_19 : i32
      scf.if %51 {
        %cst_30 = arith.constant 0.000000e+00 : f32
        %63 = vector.broadcast %cst_30 : f32 to vector<1x64xf32>
        %c0_31 = arith.constant 0 : index
        %c0_32 = arith.constant 0 : index
        %64 = vector.load %arg13[%c0_31, %c0_32] : memref<1x64xf32, #tpu.memory_space<vmem>>, vector<1x64xf32>
        tpu.vector_store %arg13[%c0_31, %c0_32], %63 {strides = array<i32>} : memref<1x64xf32, #tpu.memory_space<vmem>>, vector<1x64xf32>,
        %cst_33 = arith.constant 0.000000e+00 : f32
        %65 = vector.broadcast %cst_33 : f32 to vector<1x64xf32>
        %c0_34 = arith.constant 0 : index
        %c0_35 = arith.constant 0 : index
        %66 = vector.load %arg14[%c0_34, %c0_35] : memref<1x64xf32, #tpu.memory_space<vmem>>, vector<1x64xf32>
        tpu.vector_store %arg14[%c0_34, %c0_35], %65 {strides = array<i32>} : memref<1x64xf32, #tpu.memory_space<vmem>>, vector<1x64xf32>,
      } else {
      }
      %c0_20 = arith.constant 0 : index
      %c0_21 = arith.constant 0 : index
      %52 = vector.load %arg13[%c0_20, %c0_21] : memref<1x64xf32, #tpu.memory_space<vmem>>, vector<1x64xf32>
      %cst_22 = arith.constant dense<0.000000e+00> : vector<64xf32>
      %53 = vector.multi_reduction <add>, %46, %cst_22 [0] : vector<16x64xf32> to vector<64xf32>
      %54 = vector.shape_cast %53 : vector<64xf32> to vector<1x64xf32>
      %55 = arith.addf %52, %54 : vector<1x64xf32>
      %c0_23 = arith.constant 0 : index
      %c0_24 = arith.constant 0 : index
      %56 = vector.load %arg13[%c0_23, %c0_24] : memref<1x64xf32, #tpu.memory_space<vmem>>, vector<1x64xf32>
      tpu.vector_store %arg13[%c0_23, %c0_24], %55 {strides = array<i32>} : memref<1x64xf32, #tpu.memory_space<vmem>>, vector<1x64xf32>,
      %c0_25 = arith.constant 0 : index
      %c0_26 = arith.constant 0 : index
      %57 = vector.load %arg14[%c0_25, %c0_26] : memref<1x64xf32, #tpu.memory_space<vmem>>, vector<1x64xf32>
      %58 = arith.mulf %46, %46 : vector<16x64xf32>
      %cst_27 = arith.constant dense<0.000000e+00> : vector<64xf32>
      %59 = vector.multi_reduction <add>, %58, %cst_27 [0] : vector<16x64xf32> to vector<64xf32>
      %60 = vector.shape_cast %59 : vector<64xf32> to vector<1x64xf32>
      %61 = arith.addf %57, %60 : vector<1x64xf32>
      %c0_28 = arith.constant 0 : index
      %c0_29 = arith.constant 0 : index
      %62 = vector.load %arg14[%c0_28, %c0_29] : memref<1x64xf32, #tpu.memory_space<vmem>>, vector<1x64xf32>
      tpu.vector_store %arg14[%c0_28, %c0_29], %61 {strides = array<i32>} : memref<1x64xf32, #tpu.memory_space<vmem>>, vector<1x64xf32>,
    } else {
    }
    %c2_i32 = arith.constant 2 : i32
    %8 = arith.cmpi eq, %arg0, %c2_i32 : i32
    %9 = arith.extui %8 : i1 to i32
    %c0_i32_2 = arith.constant 0 : i32
    %10 = arith.cmpi ne, %9, %c0_i32_2 : i32
    scf.if %10 {
      %c0 = arith.constant 0 : index
      %c0_4 = arith.constant 0 : index
      %14 = vector.load %arg13[%c0, %c0_4] : memref<1x64xf32, #tpu.memory_space<vmem>>, vector<1x64xf32>
      %cst = arith.constant 1.562500e-02 : f32
      %15 = vector.broadcast %cst : f32 to vector<1x64xf32>
      %16 = arith.mulf %14, %15 : vector<1x64xf32>
      %c0_5 = arith.constant 0 : index
      %c0_6 = arith.constant 0 : index
      %17 = vector.load %arg14[%c0_5, %c0_6] : memref<1x64xf32, #tpu.memory_space<vmem>>, vector<1x64xf32>
      %cst_7 = arith.constant 1.562500e-02 : f32
      %18 = vector.broadcast %cst_7 : f32 to vector<1x64xf32>
      %19 = arith.mulf %17, %18 : vector<1x64xf32>
      %20 = arith.mulf %16, %16 : vector<1x64xf32>
      %21 = arith.subf %19, %20 : vector<1x64xf32>
      %cst_8 = arith.constant 0.000000e+00 : f32
      %22 = vector.broadcast %cst_8 : f32 to vector<1x64xf32>
      %23 = arith.maximumf %21, %22 : vector<1x64xf32>
      %cst_9 = arith.constant 9.99999974E-6 : f32
      %24 = vector.broadcast %cst_9 : f32 to vector<1x64xf32>
      %25 = arith.addf %23, %24 : vector<1x64xf32>
      %26 = math.rsqrt %25 : vector<1x64xf32>
      %27 = arith.index_cast %1 : i32 to index
      %c0_10 = arith.constant 0 : index
      %28 = vector.load %arg10[%27, %c0_10] : memref<64x64xf32, #tpu.memory_space<vmem>>, vector<16x64xf32>
      %29 = vector.broadcast %16 : vector<1x64xf32> to vector<16x64xf32>
      %30 = arith.subf %28, %29 : vector<16x64xf32>
      %31 = vector.broadcast %26 : vector<1x64xf32> to vector<16x64xf32>
      %32 = arith.mulf %30, %31 : vector<16x64xf32>
      %c4 = arith.constant 4 : index
      %c0_11 = arith.constant 0 : index
      %33 = vector.load %arg4[%c4, %c0_11] : memref<8x64xf32, #tpu.memory_space<vmem>>, vector<1x64xf32>
      %c0_12 = arith.constant 0 : index
      %c0_13 = arith.constant 0 : index
      %34 = vector.load %arg6[%c0_12, %c0_13] : memref<64x64xf32, #tpu.memory_space<vmem>>, vector<64x64xf32>
      %cst_14 = arith.constant dense<0.000000e+00> : vector<16x64xf32>
      %35 = tpu.matmul %32, %34, %cst_14 {dimension_numbers = #tpu.dot_dimension_numbers<[1], [0], [0], [1], [0, 0, 1, 1], [], []>} : vector<16x64xf32>, vector<64x64xf32>, vector<16x64xf32> -> vector<16x64xf32>
      %36 = vector.broadcast %33 : vector<1x64xf32> to vector<16x64xf32>
      %37 = arith.addf %35, %36 : vector<16x64xf32>
      %c5 = arith.constant 5 : index
      %c0_15 = arith.constant 0 : index
      %38 = vector.load %arg4[%c5, %c0_15] : memref<8x64xf32, #tpu.memory_space<vmem>>, vector<1x64xf32>
      %39 = vector.broadcast %38 : vector<1x64xf32> to vector<16x64xf32>
      %40 = arith.mulf %39, %37 : vector<16x64xf32>
      %41 = arith.negf %40 : vector<16x64xf32>
      %42 = math.exp %41 : vector<16x64xf32>
      %cst_16 = arith.constant 1.000000e+00 : f32
      %43 = vector.broadcast %cst_16 : f32 to vector<16x64xf32>
      %44 = arith.addf %43, %42 : vector<16x64xf32>
      %45 = arith.divf %43, %44 : vector<16x64xf32>
      %46 = arith.mulf %37, %45 : vector<16x64xf32>
      %47 = arith.index_cast %1 : i32 to index
      %c0_17 = arith.constant 0 : index
      %48 = vector.load %arg10[%47, %c0_17] : memref<64x64xf32, #tpu.memory_space<vmem>>, vector<16x64xf32>
      tpu.vector_store %arg10[%47, %c0_17], %46 {strides = array<i32>} : memref<64x64xf32, #tpu.memory_space<vmem>>, vector<16x64xf32>,
      %c0_18 = arith.constant 0 : index
      %c0_19 = arith.constant 0 : index
      %49 = vector.load %arg8[%c0_18, %c0_19] : memref<1x128xf32, #tpu.memory_space<vmem>>, vector<1x128xf32>
      %c0_20 = arith.constant 0 : index
      %c0_21 = arith.constant 0 : index
      %50 = vector.load %arg7[%c0_20, %c0_21] : memref<64x128xf32, #tpu.memory_space<vmem>>, vector<64x128xf32>
      %cst_22 = arith.constant dense<0.000000e+00> : vector<16x128xf32>
      %51 = tpu.matmul %46, %50, %cst_22 {dimension_numbers = #tpu.dot_dimension_numbers<[1], [0], [0], [1], [0, 0, 1, 1], [], []>} : vector<16x64xf32>, vector<64x128xf32>, vector<16x128xf32> -> vector<16x128xf32>
      %52 = vector.broadcast %49 : vector<1x128xf32> to vector<16x128xf32>
      %53 = arith.addf %51, %52 : vector<16x128xf32>
      %c0_i32_23 = arith.constant 0 : i32
      %54 = arith.cmpi eq, %arg1, %c0_i32_23 : i32
      %55 = arith.extui %54 : i1 to i32
      %c0_i32_24 = arith.constant 0 : i32
      %56 = arith.cmpi ne, %55, %c0_i32_24 : i32
      scf.if %56 {
        %cst_35 = arith.constant 0.000000e+00 : f32
        %68 = vector.broadcast %cst_35 : f32 to vector<1x128xf32>
        %c0_36 = arith.constant 0 : index
        %c0_37 = arith.constant 0 : index
        %69 = vector.load %arg15[%c0_36, %c0_37] : memref<1x128xf32, #tpu.memory_space<vmem>>, vector<1x128xf32>
        tpu.vector_store %arg15[%c0_36, %c0_37], %68 {strides = array<i32>} : memref<1x128xf32, #tpu.memory_space<vmem>>, vector<1x128xf32>,
        %cst_38 = arith.constant 0.000000e+00 : f32
        %70 = vector.broadcast %cst_38 : f32 to vector<1x128xf32>
        %c0_39 = arith.constant 0 : index
        %c0_40 = arith.constant 0 : index
        %71 = vector.load %arg16[%c0_39, %c0_40] : memref<1x128xf32, #tpu.memory_space<vmem>>, vector<1x128xf32>
        tpu.vector_store %arg16[%c0_39, %c0_40], %70 {strides = array<i32>} : memref<1x128xf32, #tpu.memory_space<vmem>>, vector<1x128xf32>,
      } else {
      }
      %c0_25 = arith.constant 0 : index
      %c0_26 = arith.constant 0 : index
      %57 = vector.load %arg15[%c0_25, %c0_26] : memref<1x128xf32, #tpu.memory_space<vmem>>, vector<1x128xf32>
      %cst_27 = arith.constant dense<0.000000e+00> : vector<128xf32>
      %58 = vector.multi_reduction <add>, %53, %cst_27 [0] : vector<16x128xf32> to vector<128xf32>
      %59 = vector.shape_cast %58 : vector<128xf32> to vector<1x128xf32>
      %60 = arith.addf %57, %59 : vector<1x128xf32>
      %c0_28 = arith.constant 0 : index
      %c0_29 = arith.constant 0 : index
      %61 = vector.load %arg15[%c0_28, %c0_29] : memref<1x128xf32, #tpu.memory_space<vmem>>, vector<1x128xf32>
      tpu.vector_store %arg15[%c0_28, %c0_29], %60 {strides = array<i32>} : memref<1x128xf32, #tpu.memory_space<vmem>>, vector<1x128xf32>,
      %c0_30 = arith.constant 0 : index
      %c0_31 = arith.constant 0 : index
      %62 = vector.load %arg16[%c0_30, %c0_31] : memref<1x128xf32, #tpu.memory_space<vmem>>, vector<1x128xf32>
      %63 = arith.mulf %53, %53 : vector<16x128xf32>
      %cst_32 = arith.constant dense<0.000000e+00> : vector<128xf32>
      %64 = vector.multi_reduction <add>, %63, %cst_32 [0] : vector<16x128xf32> to vector<128xf32>
      %65 = vector.shape_cast %64 : vector<128xf32> to vector<1x128xf32>
      %66 = arith.addf %62, %65 : vector<1x128xf32>
      %c0_33 = arith.constant 0 : index
      %c0_34 = arith.constant 0 : index
      %67 = vector.load %arg16[%c0_33, %c0_34] : memref<1x128xf32, #tpu.memory_space<vmem>>, vector<1x128xf32>
      tpu.vector_store %arg16[%c0_33, %c0_34], %66 {strides = array<i32>} : memref<1x128xf32, #tpu.memory_space<vmem>>, vector<1x128xf32>,
    } else {
    }
    %c3_i32 = arith.constant 3 : i32
    %11 = arith.cmpi eq, %arg0, %c3_i32 : i32
    %12 = arith.extui %11 : i1 to i32
    %c0_i32_3 = arith.constant 0 : i32
    %13 = arith.cmpi ne, %12, %c0_i32_3 : i32
    scf.if %13 {
      %c0 = arith.constant 0 : index
      %c0_4 = arith.constant 0 : index
      %14 = vector.load %arg15[%c0, %c0_4] : memref<1x128xf32, #tpu.memory_space<vmem>>, vector<1x128xf32>
      %cst = arith.constant 1.562500e-02 : f32
      %15 = vector.broadcast %cst : f32 to vector<1x128xf32>
      %16 = arith.mulf %14, %15 : vector<1x128xf32>
      %c0_5 = arith.constant 0 : index
      %c0_6 = arith.constant 0 : index
      %17 = vector.load %arg16[%c0_5, %c0_6] : memref<1x128xf32, #tpu.memory_space<vmem>>, vector<1x128xf32>
      %cst_7 = arith.constant 1.562500e-02 : f32
      %18 = vector.broadcast %cst_7 : f32 to vector<1x128xf32>
      %19 = arith.mulf %17, %18 : vector<1x128xf32>
      %20 = arith.mulf %16, %16 : vector<1x128xf32>
      %21 = arith.subf %19, %20 : vector<1x128xf32>
      %cst_8 = arith.constant 0.000000e+00 : f32
      %22 = vector.broadcast %cst_8 : f32 to vector<1x128xf32>
      %23 = arith.maximumf %21, %22 : vector<1x128xf32>
      %cst_9 = arith.constant 9.99999974E-6 : f32
      %24 = vector.broadcast %cst_9 : f32 to vector<1x128xf32>
      %25 = arith.addf %23, %24 : vector<1x128xf32>
      %26 = math.rsqrt %25 : vector<1x128xf32>
      %27 = arith.index_cast %1 : i32 to index
      %c0_10 = arith.constant 0 : index
      %28 = vector.load %arg10[%27, %c0_10] : memref<64x64xf32, #tpu.memory_space<vmem>>, vector<16x64xf32>
      %c0_11 = arith.constant 0 : index
      %c0_12 = arith.constant 0 : index
      %29 = vector.load %arg8[%c0_11, %c0_12] : memref<1x128xf32, #tpu.memory_space<vmem>>, vector<1x128xf32>
      %c0_13 = arith.constant 0 : index
      %c0_14 = arith.constant 0 : index
      %30 = vector.load %arg7[%c0_13, %c0_14] : memref<64x128xf32, #tpu.memory_space<vmem>>, vector<64x128xf32>
      %cst_15 = arith.constant dense<0.000000e+00> : vector<16x128xf32>
      %31 = tpu.matmul %28, %30, %cst_15 {dimension_numbers = #tpu.dot_dimension_numbers<[1], [0], [0], [1], [0, 0, 1, 1], [], []>} : vector<16x64xf32>, vector<64x128xf32>, vector<16x128xf32> -> vector<16x128xf32>
      %32 = vector.broadcast %29 : vector<1x128xf32> to vector<16x128xf32>
      %33 = arith.addf %31, %32 : vector<16x128xf32>
      %34 = vector.broadcast %16 : vector<1x128xf32> to vector<16x128xf32>
      %35 = arith.subf %33, %34 : vector<16x128xf32>
      %36 = vector.broadcast %26 : vector<1x128xf32> to vector<16x128xf32>
      %37 = arith.mulf %35, %36 : vector<16x128xf32>
      %c0_16 = arith.constant 0 : index
      %c0_17 = arith.constant 0 : index
      %38 = vector.load %arg9[%c0_16, %c0_17] : memref<16x128xf32, #tpu.memory_space<vmem>>, vector<16x128xf32>
      tpu.vector_store %arg9[%c0_16, %c0_17], %37 {strides = array<i32>} : memref<16x128xf32, #tpu.memory_space<vmem>>, vector<16x128xf32>,
    } else {
    }
    return
  }
  func.func @transform_0(%arg0: i32, %arg1: i32) -> (i32, i32) {
    %c0_i32 = arith.constant 0 : i32
    %0 = arith.cmpi eq, %arg0, %c0_i32 : i32
    %c3_i32 = arith.constant 3 : i32
    %1 = arith.select %0, %arg1, %c3_i32 : i32
    %c0_i32_0 = arith.constant 0 : i32
    %c0_i32_1 = arith.constant 0 : i32
    return %1, %c0_i32_0 : i32, i32
  }
  func.func @transform_1(%arg0: i32, %arg1: i32) -> (i32, i32) {
    %c0_i32 = arith.constant 0 : i32
    %c0_i32_0 = arith.constant 0 : i32
    %c0_i32_1 = arith.constant 0 : i32
    return %c0_i32, %c0_i32_0 : i32, i32
  }
  func.func @transform_2(%arg0: i32, %arg1: i32) -> (i32, i32) {
    %c0_i32 = arith.constant 0 : i32
    %c0_i32_0 = arith.constant 0 : i32
    %c0_i32_1 = arith.constant 0 : i32
    return %c0_i32, %c0_i32_0 : i32, i32
  }
  func.func @transform_3(%arg0: i32, %arg1: i32) -> (i32, i32) {
    %c0_i32 = arith.constant 0 : i32
    %c0_i32_0 = arith.constant 0 : i32
    %c0_i32_1 = arith.constant 0 : i32
    return %c0_i32, %c0_i32_0 : i32, i32
  }
  func.func @transform_4(%arg0: i32, %arg1: i32) -> (i32, i32) {
    %c0_i32 = arith.constant 0 : i32
    %c0_i32_0 = arith.constant 0 : i32
    %c0_i32_1 = arith.constant 0 : i32
    return %c0_i32, %c0_i32_0 : i32, i32
  }
  func.func @transform_5(%arg0: i32, %arg1: i32) -> (i32, i32) {
    %c0_i32 = arith.constant 0 : i32
    %c0_i32_0 = arith.constant 0 : i32
    %c0_i32_1 = arith.constant 0 : i32
    return %c0_i32, %c0_i32_0 : i32, i32
  }
  func.func @transform_6(%arg0: i32, %arg1: i32) -> (i32, i32) {
    %c0_i32 = arith.constant 0 : i32
    %c0_i32_0 = arith.constant 0 : i32
    %c0_i32_1 = arith.constant 0 : i32
    return %c0_i32, %c0_i32_0 : i32, i32
  }
  func.func @transform_7(%arg0: i32, %arg1: i32) -> (i32, i32) {
    %c3_i32 = arith.constant 3 : i32
    %0 = arith.cmpi eq, %arg0, %c3_i32 : i32
    %c0_i32 = arith.constant 0 : i32
    %1 = arith.select %0, %arg1, %c0_i32 : i32
    %c0_i32_0 = arith.constant 0 : i32
    %c0_i32_1 = arith.constant 0 : i32
    return %1, %c0_i32_0 : i32, i32
  }
}

</mosaic_0001>

<bundles_post_ra>
// kernel: tpu_custom_call.1
= control target key start
LH: loop header
LB: loop body
LE: loop exit
PB: predicated region body
PF: predicated region fallthrough
CT: control target
= control target key end

     0   :  { %12 = vsyncpa [#allocation10], 0  ;;  %s1763_s0 = inlined_call_operand.vmem [shape: f32[64,256], index: 0, kind: input, shape index: {}]   ;;  %s1764_s1 = inlined_call_operand.vmem [shape: f32[256,64], index: 1, kind: input, shape index: {}]   ;;  %s1765_s2 = inlined_call_operand.vmem [shape: f32[8,64], index: 2, kind: input, shape index: {}]   ;;  %s1766_s3 = inlined_call_operand.vmem [shape: f32[64,64], index: 3, kind: input, shape index: {}]   ;;  %s1767_s4 = inlined_call_operand.vmem [shape: f32[64,64], index: 4, kind: input, shape index: {}]   ;;  %s1768_s5 = inlined_call_operand.vmem [shape: f32[64,128], index: 5, kind: input, shape index: {}]   ;;  %s1769_s6 = inlined_call_operand.vmem [shape: f32[1,128], index: 6, kind: input, shape index: {}]   ;;  %s1770_s7 = inlined_call_operand.hbm [shape: f32[64,128], index: 7, kind: output, shape index: {}]  }
   0x1   :  { %14 = vsyncpa [#allocation10 + $0x1], 0  ;;  %s1366_s24 = smov 0   ;;  %s1368_s25 = smov 0  }
   0x2   :  { %s1370_s26 = smov 0   ;;  %s1372_s27 = smov 0  }
   0x3   :  { %s1374_s28 = smov 0   ;;  %s1376_s29 = smov 0  }
   0x4   :  { %s1378_s30 = smov 0   ;;  %s1380_s8 = smov 0  }
   0x5 LB: > { %1775 = sst [smem:[#allocation12_spill]] %s1315_s30  ;;  %s1009_s9 = sadd.s32 4294967295, %s1319_s8   ;;  %s1319_s8 = sphi %s1380_s8, %s20_s8   ;;  %s1315_s30 = sphi %s1378_s30, %s1783_s30   ;;  %s1311_s29 = sphi %s1376_s29, %s1788_s29   ;;  %s1307_s28 = sphi %s1374_s28, %s1781_s28   ;;  %s1303_s27 = sphi %s1372_s27, %s1787_s27   ;;  %s1299_s26 = sphi %s1370_s26, %s1786_s26   ;;  %s1295_s25 = sphi %s1368_s25, %s1785_s25   ;;  %s1291_s24 = sphi %s1366_s24, %s1784_s24  }
   0x6   : > { %s29_s10 = sadd.s32 1, %s1311_s29  ;;  %s32_s11 = sadd.s32 1, %s1315_s30 }
   0x7   : > { %p30_p0 = scmp.ge.s32.totalorder %s29_s10, 4  ;;  %p192_p1 = scmp.eq.s32.totalorder %s1315_s30, 3 }
   0x8   : > { %s1010_s12 = sadd.s32 4294967294, %s1319_s8   ;;  %p209_p2 = scmp.ne.s32.totalorder %s1299_s26, %s1295_s25 }
   0x9   : > { %s1790_s10 = smov (%p30_p0, %s29_s10), 0  ;;  %s1792_s11 = smov (!%p30_p0, %s32_s11), %s1315_s30 }
   0xa   : > { %1776 = sst [smem:[#allocation13_spill]] %s1790_s10  ;;  %p34_p3 = scmp.ge.s32.totalorder %s1792_s11, 4 }
   0xb   : > { %s193_s13 = scalar_select %p192_p1, %s1311_s29, 0 }
   0xc   : > { %p210_p4 = scmp.eq.s32.totalorder %s1009_s9, 15  ;;  %p215_p5 = scmp.ne.s32.totalorder %s1295_s25, %s1291_s24 }
   0xd   : > { %p216_p6 = scmp.eq.s32.totalorder %s1010_s12, 15  ;;  %s1794_s11 = smov (%p34_p3, %s1792_s11), 0 }
   0xe   : > { %1777 = sst [smem:[#allocation14_spill]] %s1794_s11  ;;  %p1421_p7 = por %p210_p4, %p209_p2 }
   0xf   : > { %p1425_p8 = por %p216_p6, %p215_p5  ;;  %p194_p9 = scmp.eq.s32.totalorder %s1794_s11, 3 }
  0x10   : > { %p1013_p10 = scmp.ge.s32.totalorder %s1319_s8, 1  ;;  %p266_p11 = scmp.lt.s32.totalorder %s1319_s8, 17 }
  0x11   : > { %s195_s16 = scalar_select %p194_p9, %s1790_s10, 0 }
  0x12   : > { %p267_p12 = pnand %p1013_p10, %p266_p11  ;;  %s199_s18 = sadd.s32 1, %s1299_s26 }
  0x13   : > { %s196_s17 = ssub.s32 %s193_s13, %s195_s16  ;;  %s1773_s20 = sand.u32 (!%p267_p12), 1, %s1295_s25  }
  0x14   : > { %p197_p13 = scmp.eq.s32.totalorder %s196_s17, 0  ;;  %270 = sbr.rel (%p267_p12) target bundleno = 1021 (0x3fd), region = 48 }
  0x15   : > { %p301_p0 = scmp.eq.s32.totalorder (!%p267_p12), %s1307_s28, 0  ;;  %s1014_s21 = sshll.u32 (!%p267_p12), %s1773_s20, 4 }
  0x16   : > { %s1435_s19 = scalar_select %p197_p13, %s1299_s26, %s199_s18  }
  0x17   : > { %s1442_s22 = sshll.u32 (!%p267_p12), %s1303_s27, 4  ;;  %s1450_s18 = scalar_lea.vmem (!%p267_p12), [#allocation9], %s1014_s21 }
  0x18   : > { %p1019_p2 = scmp.ne.s32.totalorder (!%p267_p12), %s1307_s28, 0 }
  0x19   : > { %s302_s23 = scalar_select %p301_p0, %s1303_s27, 3 }
  0x1a   : > { %p1022_p3 = scmp.ne.s32.totalorder (!%p1019_p2), %s1303_s27, 0 }
  0x1b   : > { %s1015_s9 = sshll.u32 %s302_s23, 1 }
  0x1c   : > { %p304_p1 = scmp.lt.s32.totalorder %s1015_s9, 7  ;;  %319 = sbr.rel (%p1019_p2) target bundleno = 257 (0x101), region = 52 }
  0x1e   : > { %s1796_s9 = smov (!%p304_p1, %s1015_s9), 7 }
  0x1f   : > { %s1045_s12 = sshll.u32 %s1796_s9, 4 }
  0x20   : > { %s1448_s17 = scalar_lea.vmem %s1763_s0, %s1045_s12 }
  0x21   : > { %v340_v0 = vld [vmem:[%s1764_s1 + $0x78] sm:$0xff]  ;;  %v339_v1 = vld [vmem:[%s1764_s1 + $0x70] sm:$0xff]  ;;  %v338_v4 = vld [vmem:[%s1764_s1 + $0x68] sm:$0xff]  ;;  %vm449_vm4 = vcmask 523264  }
  0x22   : > { %v356_v2 = vld [vmem:[%s1764_s1 + $0xf8] sm:$0xff]  ;;  %358 = vmatpush.msra.mxu0 %v340_v0  ;;  %1047 = vmatpush.msra.mxu2 %v340_v0  ;;  %v355_v3 = vld [vmem:[%s1764_s1 + $0xf0] sm:$0xff]  ;;  %v354_v5 = vld [vmem:[%s1764_s1 + $0xe8] sm:$0xff] }
  0x23   : > { %381 = vmatpush.msra.mxu1 %v356_v2  ;;  %1063 = vmatpush.msra.mxu3 %v356_v2  ;;  %v337_v6 = vld [vmem:[%s1764_s1 + $0x60] sm:$0xff]  ;;  %v336_v8 = vld [vmem:[%s1764_s1 + $0x58] sm:$0xff]  ;;  %v335_v10 = vld [vmem:[%s1764_s1 + $0x50] sm:$0xff] }
  0x24   : > { %359 = vmatpush.msra.mxu0 %v339_v1  ;;  %1048 = vmatpush.msra.mxu2 %v339_v1  ;;  %v353_v7 = vld [vmem:[%s1764_s1 + $0xe0] sm:$0xff]  ;;  %v352_v9 = vld [vmem:[%s1764_s1 + $0xd8] sm:$0xff]  ;;  %v351_v11 = vld [vmem:[%s1764_s1 + $0xd0] sm:$0xff] }
  0x25   : > { %382 = vmatpush.msra.mxu1 %v355_v3  ;;  %1064 = vmatpush.msra.mxu3 %v355_v3  ;;  %v334_v12 = vld [vmem:[%s1764_s1 + $0x48] sm:$0xff]  ;;  %v333_v14 = vld [vmem:[%s1764_s1 + $0x40] sm:$0xff]  ;;  %v332_v16 = vld [vmem:[%s1764_s1 + $0x38] sm:$0xff] }
  0x26   : > { %360 = vmatpush.msra.mxu0 %v338_v4  ;;  %1049 = vmatpush.msra.mxu2 %v338_v4  ;;  %v350_v13 = vld [vmem:[%s1764_s1 + $0xc8] sm:$0xff]  ;;  %v349_v15 = vld [vmem:[%s1764_s1 + $0xc0] sm:$0xff]  ;;  %v348_v17 = vld [vmem:[%s1764_s1 + $0xb8] sm:$0xff] }
  0x27   : > { %383 = vmatpush.msra.mxu1 %v354_v5  ;;  %1065 = vmatpush.msra.mxu3 %v354_v5  ;;  %v331_v18 = vld [vmem:[%s1764_s1 + $0x30] sm:$0xff]  ;;  %v330_v20 = vld [vmem:[%s1764_s1 + $0x28] sm:$0xff]  ;;  %v329_v22 = vld [vmem:[%s1764_s1 + $0x20] sm:$0xff] }
  0x28   : > { %361 = vmatpush.msra.mxu0 %v337_v6  ;;  %1050 = vmatpush.msra.mxu2 %v337_v6  ;;  %v347_v19 = vld [vmem:[%s1764_s1 + $0xb0] sm:$0xff]  ;;  %v346_v21 = vld [vmem:[%s1764_s1 + $0xa8] sm:$0xff]  ;;  %v345_v23 = vld [vmem:[%s1764_s1 + $0xa0] sm:$0xff] }
  0x29   : > { %384 = vmatpush.msra.mxu1 %v353_v7  ;;  %1066 = vmatpush.msra.mxu3 %v353_v7  ;;  %v328_v24 = vld [vmem:[%s1764_s1 + $0x18] sm:$0xff]  ;;  %v327_v26 = vld [vmem:[%s1764_s1 + $0x10] sm:$0xff]  ;;  %v326_v28 = vld [vmem:[%s1764_s1 + $0x8] sm:$0xff] }
  0x2a   : > { %362 = vmatpush.msra.mxu0 %v336_v8  ;;  %1051 = vmatpush.msra.mxu2 %v336_v8  ;;  %v344_v25 = vld [vmem:[%s1764_s1 + $0x98] sm:$0xff]  ;;  %v343_v27 = vld [vmem:[%s1764_s1 + $0x90] sm:$0xff]  ;;  %v342_v29 = vld [vmem:[%s1764_s1 + $0x88] sm:$0xff] }
  0x2b   : > { %385 = vmatpush.msra.mxu1 %v352_v9  ;;  %1067 = vmatpush.msra.mxu3 %v352_v9  ;;  %v325_v30 = vld [vmem:[%s1764_s1] sm:$0xff]  ;;  %v322_v32 = vld [vmem:[%s1448_s17 + $0x10] sm:$0xff]  ;;  %v321_v34 = vld [vmem:[%s1448_s17 + $0x8] sm:$0xff] }
  0x2c   : > { %363 = vmatpush.msra.mxu0 %v335_v10  ;;  %1052 = vmatpush.msra.mxu2 %v335_v10  ;;  %v320_v31 = vld [vmem:[%s1448_s17] sm:$0xff]  ;;  %v323_v35 = vld [vmem:[%s1448_s17 + $0x18] sm:$0xff]  ;;  %s448_s17 = scalar_lea.vmem [#allocation2], %s1442_s22 }
  0x2d   : > { %386 = vmatpush.msra.mxu1 %v351_v11  ;;  %1068 = vmatpush.msra.mxu3 %v351_v11  ;;  %v341_v33 = vld [vmem:[%s1764_s1 + $0x80] sm:$0xff] }
  0x2e   : > { %364 = vmatpush.msra.mxu0 %v334_v12  ;;  %1053 = vmatpush.msra.mxu2 %v334_v12  ;;  %v1187_v36 = vld [vmem:[%s1765_s2] ss:$0 sm:$0xff]  ;;  %v1188_v39 = vld [vmem:[%s1765_s2 + $0x1] ss:$0 sm:$0xff] }
  0x2f   : > { %387 = vmatpush.msra.mxu1 %v350_v13  ;;  %1069 = vmatpush.msra.mxu3 %v350_v13 }
  0x30   : > { %365 = vmatpush.msra.mxu0 %v333_v14  ;;  %1054 = vmatpush.msra.mxu2 %v333_v14 }
  0x31   : > { %388 = vmatpush.msra.mxu1 %v349_v15  ;;  %1070 = vmatpush.msra.mxu3 %v349_v15 }
  0x32   : > { %366 = vmatpush.msra.mxu0 %v332_v16  ;;  %1055 = vmatpush.msra.mxu2 %v332_v16 }
  0x33   : > { %389 = vmatpush.msra.mxu1 %v348_v17  ;;  %1071 = vmatpush.msra.mxu3 %v348_v17 }
  0x34   : > { %367 = vmatpush.msra.mxu0 %v331_v18  ;;  %1056 = vmatpush.msra.mxu2 %v331_v18 }
  0x35   : > { %390 = vmatpush.msra.mxu1 %v347_v19  ;;  %1072 = vmatpush.msra.mxu3 %v347_v19 }
  0x36   : > { %368 = vmatpush.msra.mxu0 %v330_v20  ;;  %1057 = vmatpush.msra.mxu2 %v330_v20 }
  0x37   : > { %391 = vmatpush.msra.mxu1 %v346_v21  ;;  %1073 = vmatpush.msra.mxu3 %v346_v21 }
  0x38   : > { %369 = vmatpush.msra.mxu0 %v329_v22  ;;  %1058 = vmatpush.msra.mxu2 %v329_v22 }
  0x39   : > { %392 = vmatpush.msra.mxu1 %v345_v23  ;;  %1074 = vmatpush.msra.mxu3 %v345_v23 }
  0x3a   : > { %370 = vmatpush.msra.mxu0 %v328_v24  ;;  %1059 = vmatpush.msra.mxu2 %v328_v24 }
  0x3b   : > { %393 = vmatpush.msra.mxu1 %v344_v25  ;;  %1075 = vmatpush.msra.mxu3 %v344_v25 }
  0x3c   : > { %371 = vmatpush.msra.mxu0 %v327_v26  ;;  %1060 = vmatpush.msra.mxu2 %v327_v26 }
  0x3d   : > { %394 = vmatpush.msra.mxu1 %v343_v27  ;;  %1076 = vmatpush.msra.mxu3 %v343_v27 }
  0x3e   : > { %372 = vmatpush.msra.mxu0 %v326_v28  ;;  %1061 = vmatpush.msra.mxu2 %v326_v28 }
  0x3f   : > { %395 = vmatpush.msra.mxu1 %v342_v29  ;;  %1077 = vmatpush.msra.mxu3 %v342_v29 }
  0x40   : > { %373 = vmatpush.msra.mxu0 %v325_v30  ;;  %1062 = vmatpush.msra.mxu2 %v325_v30 }
  0x41   : > { %374 = vmatmul.f32.vlgmr.msra.gmra.mxu0 %v320_v31  ;;  %377 = vmatmul.f32.vlgmr.msra.gmra.mxu2 %v322_v32 }
  0x42   : > { %396 = vmatpush.msra.mxu1 %v341_v33  ;;  %1078 = vmatpush.msra.mxu3 %v341_v33 }
  0x43   : > { %397 = vmatmul.f32.vlgmr.msra.gmra.mxu1 %v321_v34  ;;  %400 = vmatmul.f32.vlgmr.msra.gmra.mxu3 %v323_v35 }
  0xbe   : > { %v375_v37 = vpop.f32.mrf.mxu0 }
  0xbf   : > { %v376_v38 = vadd.f32 %v1187_v36, %v375_v37 }
  0xc0   : > { %v398_v40 = vpop.f32.mrf.mxu1 }
  0xc1   : > { %v399_v41 = vadd.f32 %v398_v40, %v376_v38 }
  0xc3   : > { %v406_v42 = vmul.f32 %v1188_v39, %v399_v41 }
  0xc4   : > { %v378_v43 = vpop.f32.mrf.mxu2 }
  0xc5   : > { %v1020_v44 = vmul.f32 -1.442695, %v406_v42  ;;  %v379_v45 = vadd.f32 %v1187_v36, %v378_v43 }
  0xc6   : > { %v401_v46 = vpop.f32.mrf.mxu3 }
  0xc7   : > { %1189 = vpow2.f32 %v1020_v44  ;;  %v402_v47 = vadd.f32 %v401_v46, %v379_v45 }
  0xc9   : > { %v407_v48 = vmul.f32 %v1188_v39, %v402_v47 }
  0xcb   : > { %v1021_v49 = vmul.f32 -1.442695, %v407_v48 }
  0xcd   : > { %v1190_v50 = vpop.eup %1189  ;;  %1191 = vpow2.f32 %v1021_v49 }
  0xce   : > { %v414_v51 = vadd.f32 1.0, %v1190_v50 }
  0xd0   : > { %1193 = vrcp.f32 %v414_v51  ;;  %v427_v57 = vand.u32 2147483648, %v414_v51  ;;  %vm421_vm0 = vweird.f32 %v414_v51  ;;  %v425_v59 = vand.u32 2147483647, %v414_v51 }
  0xd2   : > { %v428_v63 = vor.u32 1.1754944e-38, %v427_v57  ;;  %vm426_vm3 = vcmp.eq.f32.partialorder %v425_v59, 8.507059e+37 }
  0xd3   : > { %v1192_v52 = vpop.eup %1191 }
  0xd4   : > { %v415_v53 = vadd.f32 1.0, %v1192_v52 }
  0xd6   : > { %v1194_v54 = vpop.eup %1193  ;;  %1195 = vrcp.f32 %v415_v53  ;;  %v442_v3 = vand.u32 2147483648, %v415_v53  ;;  %v440_v6 = vand.u32 2147483647, %v415_v53  ;;  %vm436_vm6 = vweird.f32 %v415_v53 }
  0xd7   : > { %v417_v55 = vmul.f32 %v1194_v54, %v414_v51  ;;  %vm422_vm1 = vweird.f32 %v1194_v54 }
  0xd8   : > { %vm423_vm2 = vmor %vm421_vm0, %vm422_vm1  ;;  %v443_v8 = vor.u32 1.1754944e-38, %v442_v3  ;;  %vm441_vm8 = vcmp.eq.f32.partialorder %v440_v6, 8.507059e+37 }
  0xd9   : > { %v418_v56 = vsub.f32 1.0, %v417_v55 }
  0xdb   : > { %v419_v58 = vmul.f32 %v1194_v54, %v418_v56 }
  0xdc   : > { %v1196_v60 = vpop.eup %1195 }
  0xdd   : > { %v420_v61 = vadd.f32 %v1194_v54, %v419_v58  ;;  %v432_v62 = vmul.f32 %v1196_v60, %v415_v53  ;;  %vm437_vm5 = vweird.f32 %v1196_v60 }
  0xde   : > { %vm438_vm7 = vmor %vm436_vm6, %vm437_vm5 }
  0xdf   : > { %v424_v0 = vsel %vm423_vm2, %v1194_v54, %v420_v61  ;;  %v433_v1 = vsub.f32 1.0, %v432_v62 }
  0xe0   : > { %v429_v2 = vsel %vm426_vm3, %v428_v63, %v424_v0 }
  0xe1   : > { %v446_v4 = vmul.f32 %v429_v2, %v399_v41  ;;  %v434_v5 = vmul.f32 %v1196_v60, %v433_v1 }
  0xe3   : > { %450 = vst.msk [vmem:[%s448_s17] sm:$0xff] %vm449_vm4, %v446_v4  ;;  %v435_v7 = vadd.f32 %v1196_v60, %v434_v5 }
  0xe5   : > { %v439_v9 = vsel %vm438_vm7, %v1196_v60, %v435_v7  ;;  %455 = sbr.rel (%p1022_p3) target bundleno = 237 (0xed), region = 56 }
  0xe6   : > { %v444_v10 = vsel %vm441_vm8, %v443_v8, %v439_v9 }
  0xe7   : > { %v447_v11 = vmul.f32 %v444_v10, %v402_v47 }
  0xe9   : > { %451 = vst.msk [vmem:[%s448_s17 + $0x8] sm:$0xff] %vm449_vm4, %v447_v11 }
  0xea   : > { %vm456_vm9 = vcmask 516096   ;;  %v1321_v12 = vmov 0.0  }
  0xeb   : > { %457 = vst.msk [vmem:[#allocation3] sm:$0x1] %vm456_vm9, %v1321_v12 }
  0xec   : > { %458 = vst.msk [vmem:[#allocation4] sm:$0x1] %vm456_vm9, %v1321_v12 }
  0xed PF: > { %v460_v13 = vsel %vm449_vm4, %v446_v4, 0.0  ;;  %v461_v14 = vsel %vm449_vm4, %v447_v11, 0.0  ;;  %v473_v15 = vmul.f32 %v446_v4, %v446_v4  ;;  %v474_v17 = vmul.f32 %v447_v11, %v447_v11 }
  0xee   : > { %v462_v16 = vadd.f32 %v461_v14, %v460_v13  ;;  %vm470_vm10 = vcmask 516096  }
  0xef   : > { %v475_v18 = vsel %vm449_vm4, %v473_v15, 0.0  ;;  %v476_v20 = vsel %vm449_vm4, %v474_v17, 0.0 }
  0xf0   : > { %v463_v19 = vrot.slane %v462_v16, 4  ;;  %v477_v21 = vadd.f32 %v476_v20, %v475_v18 }
  0xf2   : > { %v464_v22 = vadd.f32 %v463_v19, %v462_v16  ;;  %v478_v23 = vrot.slane %v477_v21, 4  ;;  %v459_v29 = vld [vmem:[#allocation3] sm:$0x1] }
  0xf3   : > { %v472_v34 = vld [vmem:[#allocation4] sm:$0x1] }
  0xf4   : > { %v465_v24 = vrot.slane %v464_v22, 2  ;;  %v479_v25 = vadd.f32 %v478_v23, %v477_v21 }
  0xf6   : > { %v466_v26 = vadd.f32 %v465_v24, %v464_v22  ;;  %v480_v27 = vrot.slane %v479_v25, 2 }
  0xf8   : > { %v467_v28 = vrot.slane %v466_v26, 1  ;;  %v481_v30 = vadd.f32 %v480_v27, %v479_v25 }
  0xfa   : > { %v468_v31 = vadd.f32 %v467_v28, %v466_v26  ;;  %v482_v32 = vrot.slane %v481_v30, 1 }
  0xfc   : > { %v469_v33 = vadd.f32 %v468_v31, %v459_v29  ;;  %v483_v35 = vadd.f32 %v482_v32, %v481_v30 }
  0xfe   : > { %471 = vst.msk [vmem:[#allocation3] sm:$0x1] %vm470_vm10, %v469_v33  ;;  %v484_v36 = vadd.f32 %v483_v35, %v472_v34 }
 0x100   : > { %485 = vst.msk [vmem:[#allocation4] sm:$0x1] %vm470_vm10, %v484_v36 }
 0x101 PF: > { %p1023_p4 = scmp.ne.s32.totalorder %s1307_s28, 1 }
 0x102   : > { %s1593_s20 = scalar_lea.vmem (!%p1023_p4), [#allocation2], %s1442_s22  ;;  %p1028_p5 = scmp.ne.s32.totalorder (!%p1023_p4), %s1303_s27, 0 }
 0x103   : > { %489 = sbr.rel (%p1023_p4) target bundleno = 483 (0x1e3), region = 60 }
 0x108   : > { %v529_v37 = vld [vmem:[%s1766_s3 + $0x38] sm:$0xff]  ;;  %v528_v38 = vld [vmem:[%s1766_s3 + $0x30] sm:$0xff]  ;;  %v527_v39 = vld [vmem:[%s1766_s3 + $0x28] sm:$0xff]  ;;  %vm531_vm14 = vcmask 523264  }
 0x109   : > { %546 = vmatpush.msra.mxu0 %v529_v37  ;;  %1079 = vmatpush.msra.mxu1 %v529_v37  ;;  %v490_v40 = vld [vmem:[#allocation3] sm:$0x1]  ;;  %v492_v42 = vld [vmem:[#allocation4] sm:$0x1]  ;;  %v525_v46 = vld [vmem:[%s1766_s3 + $0x18] sm:$0xff] }
 0x10a   : > { %v491_v41 = vmul.f32 0.015625, %v490_v40  ;;  %v526_v43 = vld [vmem:[%s1766_s3 + $0x20] sm:$0xff]  ;;  %v493_v44 = vmul.f32 0.015625, %v492_v42  ;;  %v524_v48 = vld [vmem:[%s1766_s3 + $0x10] sm:$0xff]  ;;  %v523_v50 = vld [vmem:[%s1766_s3 + $0x8] sm:$0xff] }
 0x10b   : > { %547 = vmatpush.msra.mxu0 %v528_v38  ;;  %1080 = vmatpush.msra.mxu1 %v528_v38  ;;  %v522_v52 = vld [vmem:[%s1766_s3] sm:$0xff]  ;;  %v510_v60 = vld [vmem:[%s1593_s20 + $0x8] sm:$0xff] }
 0x10c   : > { %v494_v45 = vmul.f32 %v491_v41, %v491_v41  ;;  %v512_v57 = vperm.slane %v491_v41, 0  ;;  %v509_v59 = vld [vmem:[%s1593_s20] sm:$0xff] }
 0x10d   : > { %548 = vmatpush.msra.mxu0 %v527_v39  ;;  %1081 = vmatpush.msra.mxu1 %v527_v39  ;;  %v1197_v4 = vld [vmem:[%s1765_s2 + $0x2] ss:$0 sm:$0xff]  ;;  %v1198_v5 = vld [vmem:[%s1765_s2 + $0x3] ss:$0 sm:$0xff] }
 0x10e   : > { %v495_v47 = vsub.f32 %v493_v44, %v494_v45  ;;  %v514_v62 = vsub.f32 %v509_v59, %v512_v57  ;;  %v515_v63 = vsub.f32 %v510_v60, %v512_v57 }
 0x10f   : > { %549 = vmatpush.msra.mxu0 %v526_v43  ;;  %1082 = vmatpush.msra.mxu1 %v526_v43 }
 0x110   : > { %v496_v49 = vmax.f32 %v495_v47, 0.0 }
 0x111   : > { %550 = vmatpush.msra.mxu0 %v525_v46  ;;  %1083 = vmatpush.msra.mxu1 %v525_v46 }
 0x112   : > { %v497_v51 = vadd.f32 1e-05, %v496_v49 }
 0x113   : > { %551 = vmatpush.msra.mxu0 %v524_v48  ;;  %1084 = vmatpush.msra.mxu1 %v524_v48 }
 0x114   : > { %1199 = vrsqrt.f32 %v497_v51  ;;  %vm504_vm11 = vweird.f32 %v497_v51 }
 0x115   : > { %552 = vmatpush.msra.mxu0 %v523_v50  ;;  %1085 = vmatpush.msra.mxu1 %v523_v50 }
 0x117   : > { %553 = vmatpush.msra.mxu0 %v522_v52  ;;  %1086 = vmatpush.msra.mxu1 %v522_v52 }
 0x11a   : > { %v1200_v53 = vpop.eup %1199 }
 0x11b   : > { %v499_v54 = vmul.f32 %v1200_v53, %v497_v51  ;;  %vm505_vm12 = vweird.f32 %v1200_v53 }
 0x11c   : > { %vm506_vm13 = vmor %vm504_vm11, %vm505_vm12 }
 0x11d   : > { %v500_v55 = vmul.f32 %v1200_v53, %v499_v54 }
 0x11f   : > { %v501_v56 = vmul.f32 0.5, %v500_v55 }
 0x121   : > { %v502_v58 = vsub.f32 1.5, %v501_v56 }
 0x123   : > { %v503_v61 = vmul.f32 %v1200_v53, %v502_v58 }
 0x125   : > { %v507_v0 = vsel %vm506_vm13, %v1200_v53, %v503_v61 }
 0x126   : > { %v517_v1 = vperm.slane %v507_v0, 0 }
 0x128   : > { %v519_v2 = vmul.f32 %v517_v1, %v514_v62  ;;  %v520_v3 = vmul.f32 %v517_v1, %v515_v63 }
 0x12a   : > { %1024 = vmatmul.msk.f32.vlgmr.msra.gmra.mxu0 %vm531_vm14, %v519_v2  ;;  %1025 = vmatmul.msk.f32.vlgmr.msra.gmra.mxu1 %vm531_vm14, %v520_v3 }
 0x1a7   : > { %v555_v6 = vpop.f32.mrf.mxu0  ;;  %v558_v7 = vpop.f32.mrf.mxu1 }
 0x1a8   : > { %v556_v8 = vadd.f32 %v1197_v4, %v555_v6  ;;  %v559_v9 = vadd.f32 %v1197_v4, %v558_v7 }
 0x1aa   : > { %v563_v10 = vmul.f32 %v1198_v5, %v556_v8  ;;  %v564_v11 = vmul.f32 %v1198_v5, %v559_v9 }
 0x1ac   : > { %v1026_v12 = vmul.f32 -1.442695, %v563_v10  ;;  %v1027_v13 = vmul.f32 -1.442695, %v564_v11 }
 0x1ae   : > { %1201 = vpow2.f32 %v1026_v12 }
 0x1af   : > { %1203 = vpow2.f32 %v1027_v13 }
 0x1b4   : > { %v1202_v14 = vpop.eup %1201 }
 0x1b5   : > { %v1204_v15 = vpop.eup %1203  ;;  %v571_v16 = vadd.f32 1.0, %v1202_v14 }
 0x1b6   : > { %v572_v17 = vadd.f32 1.0, %v1204_v15 }
 0x1b7   : > { %1205 = vrcp.f32 %v571_v16  ;;  %v584_v23 = vand.u32 2147483648, %v571_v16  ;;  %v582_v26 = vand.u32 2147483647, %v571_v16  ;;  %vm578_vm1 = vweird.f32 %v571_v16 }
 0x1b8   : > { %1207 = vrcp.f32 %v572_v17  ;;  %v599_v27 = vand.u32 2147483648, %v572_v17  ;;  %v597_v29 = vand.u32 2147483647, %v572_v17  ;;  %vm593_vm3 = vweird.f32 %v572_v17 }
 0x1b9   : > { %v585_v31 = vor.u32 1.1754944e-38, %v584_v23  ;;  %vm583_vm4 = vcmp.eq.f32.partialorder %v582_v26, 8.507059e+37 }
 0x1ba   : > { %v600_v34 = vor.u32 1.1754944e-38, %v599_v27  ;;  %vm598_vm6 = vcmp.eq.f32.partialorder %v597_v29, 8.507059e+37 }
 0x1bd   : > { %v1206_v18 = vpop.eup %1205 }
 0x1be   : > { %v1208_v19 = vpop.eup %1207  ;;  %v574_v20 = vmul.f32 %v1206_v18, %v571_v16  ;;  %vm579_vm15 = vweird.f32 %v1206_v18 }
 0x1bf   : > { %v589_v21 = vmul.f32 %v1208_v19, %v572_v17  ;;  %vm594_vm0 = vweird.f32 %v1208_v19  ;;  %vm580_vm2 = vmor %vm578_vm1, %vm579_vm15 }
 0x1c0   : > { %v575_v22 = vsub.f32 1.0, %v574_v20  ;;  %vm595_vm5 = vmor %vm593_vm3, %vm594_vm0 }
 0x1c1   : > { %v590_v24 = vsub.f32 1.0, %v589_v21 }
 0x1c2   : > { %v576_v25 = vmul.f32 %v1206_v18, %v575_v22 }
 0x1c3   : > { %v591_v28 = vmul.f32 %v1208_v19, %v590_v24 }
 0x1c4   : > { %v577_v30 = vadd.f32 %v1206_v18, %v576_v25 }
 0x1c5   : > { %v592_v32 = vadd.f32 %v1208_v19, %v591_v28 }
 0x1c6   : > { %v581_v33 = vsel %vm580_vm2, %v1206_v18, %v577_v30 }
 0x1c7   : > { %v586_v35 = vsel %vm583_vm4, %v585_v31, %v581_v33  ;;  %v596_v36 = vsel %vm595_vm5, %v1208_v19, %v592_v32  ;;  %610 = sbr.rel (%p1028_p5) target bundleno = 463 (0x1cf), region = 64 }
 0x1c8   : > { %v603_v37 = vmul.f32 %v586_v35, %v556_v8  ;;  %v601_v38 = vsel %vm598_vm6, %v600_v34, %v596_v36 }
 0x1c9   : > { %v604_v39 = vmul.f32 %v601_v38, %v559_v9 }
 0x1ca   : > { %605 = vst.msk [vmem:[%s1593_s20] sm:$0xff] %vm531_vm14, %v603_v37 }
 0x1cb   : > { %606 = vst.msk [vmem:[%s1593_s20 + $0x8] sm:$0xff] %vm531_vm14, %v604_v39 }
 0x1cc   : > { %vm611_vm7 = vcmask 516096   ;;  %v1322_v40 = vmov 0.0  }
 0x1cd   : > { %612 = vst.msk [vmem:[#allocation5] sm:$0x1] %vm611_vm7, %v1322_v40 }
 0x1ce   : > { %613 = vst.msk [vmem:[#allocation6] sm:$0x1] %vm611_vm7, %v1322_v40 }
 0x1cf PF: > { %v615_v41 = vsel %vm531_vm14, %v603_v37, 0.0  ;;  %v616_v42 = vsel %vm531_vm14, %v604_v39, 0.0  ;;  %v628_v43 = vmul.f32 %v603_v37, %v603_v37  ;;  %v629_v45 = vmul.f32 %v604_v39, %v604_v39 }
 0x1d0   : > { %v617_v44 = vadd.f32 %v616_v42, %v615_v41  ;;  %vm625_vm8 = vcmask 516096  }
 0x1d1   : > { %v630_v46 = vsel %vm531_vm14, %v628_v43, 0.0  ;;  %v631_v48 = vsel %vm531_vm14, %v629_v45, 0.0 }
 0x1d2   : > { %v618_v47 = vrot.slane %v617_v44, 4  ;;  %v632_v49 = vadd.f32 %v631_v48, %v630_v46 }
 0x1d4   : > { %v619_v50 = vadd.f32 %v618_v47, %v617_v44  ;;  %v633_v51 = vrot.slane %v632_v49, 4  ;;  %v614_v57 = vld [vmem:[#allocation5] sm:$0x1] }
 0x1d5   : > { %v627_v62 = vld [vmem:[#allocation6] sm:$0x1] }
 0x1d6   : > { %v620_v52 = vrot.slane %v619_v50, 2  ;;  %v634_v53 = vadd.f32 %v633_v51, %v632_v49 }
 0x1d8   : > { %v621_v54 = vadd.f32 %v620_v52, %v619_v50  ;;  %v635_v55 = vrot.slane %v634_v53, 2 }
 0x1da   : > { %v622_v56 = vrot.slane %v621_v54, 1  ;;  %v636_v58 = vadd.f32 %v635_v55, %v634_v53 }
 0x1dc   : > { %v623_v59 = vadd.f32 %v622_v56, %v621_v54  ;;  %v637_v60 = vrot.slane %v636_v58, 1 }
 0x1de   : > { %v624_v61 = vadd.f32 %v623_v59, %v614_v57  ;;  %v638_v63 = vadd.f32 %v637_v60, %v636_v58 }
 0x1e0   : > { %626 = vst.msk [vmem:[#allocation5] sm:$0x1] %vm625_vm8, %v624_v61  ;;  %v639_v0 = vadd.f32 %v638_v63, %v627_v62 }
 0x1e2   : > { %640 = vst.msk [vmem:[#allocation6] sm:$0x1] %vm625_vm8, %v639_v0 }
 0x1e3 PF: > { %p1029_p6 = scmp.ne.s32.totalorder %s1307_s28, 2 }
 0x1e4   : > { %s1640_s11 = scalar_lea.vmem (!%p1029_p6), [#allocation2], %s1442_s22  ;;  %p1036_p9 = scmp.ne.s32.totalorder (!%p1029_p6), %s1303_s27, 0 }
 0x1e5   : > { %644 = sbr.rel (%p1029_p6) target bundleno = 845 (0x34d), region = 68 }
 0x1ea   : > { %v684_v1 = vld [vmem:[%s1767_s4 + $0x38] sm:$0xff]  ;;  %v683_v2 = vld [vmem:[%s1767_s4 + $0x30] sm:$0xff]  ;;  %v682_v3 = vld [vmem:[%s1767_s4 + $0x28] sm:$0xff]  ;;  %vm686_vm12 = vcmask 523264  }
 0x1eb   : > { %701 = vmatpush.msra.mxu0 %v684_v1  ;;  %1087 = vmatpush.msra.mxu2 %v684_v1  ;;  %v645_v4 = vld [vmem:[#allocation5] sm:$0x1]  ;;  %v647_v6 = vld [vmem:[#allocation6] sm:$0x1]  ;;  %v680_v10 = vld [vmem:[%s1767_s4 + $0x18] sm:$0xff] }
 0x1ec   : > { %v646_v5 = vmul.f32 0.015625, %v645_v4  ;;  %v681_v7 = vld [vmem:[%s1767_s4 + $0x20] sm:$0xff]  ;;  %v648_v8 = vmul.f32 0.015625, %v647_v6  ;;  %v679_v12 = vld [vmem:[%s1767_s4 + $0x10] sm:$0xff]  ;;  %v678_v14 = vld [vmem:[%s1767_s4 + $0x8] sm:$0xff] }
 0x1ed   : > { %702 = vmatpush.msra.mxu0 %v683_v2  ;;  %1088 = vmatpush.msra.mxu2 %v683_v2  ;;  %v677_v16 = vld [vmem:[%s1767_s4] sm:$0xff]  ;;  %v665_v24 = vld [vmem:[%s1640_s11 + $0x8] sm:$0xff]  ;;  %v770_v32 = vld [vmem:[%s1768_s5 + $0x38] sm:$0xff] }
 0x1ee   : > { %v649_v9 = vmul.f32 %v646_v5, %v646_v5  ;;  %v667_v21 = vperm.slane %v646_v5, 0  ;;  %v664_v23 = vld [vmem:[%s1640_s11] sm:$0xff]  ;;  %788 = vmatpush.msra.mxu1 %v770_v32  ;;  %1095 = vmatpush.msra.mxu3 %v770_v32  ;;  %v769_v33 = vld [vmem:[%s1768_s5 + $0x30] sm:$0xff]  ;;  %v768_v34 = vld [vmem:[%s1768_s5 + $0x28] sm:$0xff] }
 0x1ef   : > { %703 = vmatpush.msra.mxu0 %v682_v3  ;;  %1089 = vmatpush.msra.mxu2 %v682_v3  ;;  %v767_v35 = vld [vmem:[%s1768_s5 + $0x20] sm:$0xff]  ;;  %v766_v36 = vld [vmem:[%s1768_s5 + $0x18] sm:$0xff]  ;;  %v765_v38 = vld [vmem:[%s1768_s5 + $0x10] sm:$0xff] }
 0x1f0   : > { %v650_v11 = vsub.f32 %v648_v8, %v649_v9  ;;  %v669_v26 = vsub.f32 %v664_v23, %v667_v21  ;;  %v670_v27 = vsub.f32 %v665_v24, %v667_v21  ;;  %789 = vmatpush.msra.mxu1 %v769_v33  ;;  %1096 = vmatpush.msra.mxu3 %v769_v33  ;;  %v1209_v37 = vld [vmem:[%s1765_s2 + $0x4] ss:$0 sm:$0xff]  ;;  %v1210_v39 = vld [vmem:[%s1765_s2 + $0x5] ss:$0 sm:$0xff]  ;;  %v764_v40 = vld [vmem:[%s1768_s5 + $0x8] sm:$0xff] }
 0x1f1   : > { %704 = vmatpush.msra.mxu0 %v681_v7  ;;  %1090 = vmatpush.msra.mxu2 %v681_v7  ;;  %v763_v43 = vld [vmem:[%s1768_s5] sm:$0xff] }
 0x1f2   : > { %v651_v13 = vmax.f32 %v650_v11, 0.0  ;;  %790 = vmatpush.msra.mxu1 %v768_v34  ;;  %1097 = vmatpush.msra.mxu3 %v768_v34 }
 0x1f3   : > { %705 = vmatpush.msra.mxu0 %v680_v10  ;;  %1091 = vmatpush.msra.mxu2 %v680_v10 }
 0x1f4   : > { %v652_v15 = vadd.f32 1e-05, %v651_v13  ;;  %791 = vmatpush.msra.mxu1 %v767_v35  ;;  %1098 = vmatpush.msra.mxu3 %v767_v35 }
 0x1f5   : > { %706 = vmatpush.msra.mxu0 %v679_v12  ;;  %1092 = vmatpush.msra.mxu2 %v679_v12  ;;  %v1211_v12 = vld [vmem:[%s1769_s6] ss:$0 sm:$0xff] }
 0x1f6   : > { %1212 = vrsqrt.f32 %v652_v15  ;;  %vm659_vm9 = vweird.f32 %v652_v15  ;;  %792 = vmatpush.msra.mxu1 %v766_v36  ;;  %1099 = vmatpush.msra.mxu3 %v766_v36 }
 0x1f7   : > { %707 = vmatpush.msra.mxu0 %v678_v14  ;;  %1093 = vmatpush.msra.mxu2 %v678_v14 }
 0x1f8   : > { %793 = vmatpush.msra.mxu1 %v765_v38  ;;  %1100 = vmatpush.msra.mxu3 %v765_v38 }
 0x1f9   : > { %708 = vmatpush.msra.mxu0 %v677_v16  ;;  %1094 = vmatpush.msra.mxu2 %v677_v16 }
 0x1fa   : > { %794 = vmatpush.msra.mxu1 %v764_v40  ;;  %1101 = vmatpush.msra.mxu3 %v764_v40 }
 0x1fc   : > { %v1213_v17 = vpop.eup %1212  ;;  %795 = vmatpush.msra.mxu1 %v763_v43  ;;  %1102 = vmatpush.msra.mxu3 %v763_v43 }
 0x1fd   : > { %v654_v18 = vmul.f32 %v1213_v17, %v652_v15  ;;  %vm660_vm10 = vweird.f32 %v1213_v17 }
 0x1fe   : > { %vm661_vm11 = vmor %vm659_vm9, %vm660_vm10 }
 0x1ff   : > { %v655_v19 = vmul.f32 %v1213_v17, %v654_v18 }
 0x201   : > { %v656_v20 = vmul.f32 0.5, %v655_v19 }
 0x203   : > { %v657_v22 = vsub.f32 1.5, %v656_v20 }
 0x205   : > { %v658_v25 = vmul.f32 %v1213_v17, %v657_v22 }
 0x207   : > { %v662_v28 = vsel %vm661_vm11, %v1213_v17, %v658_v25 }
 0x208   : > { %v672_v29 = vperm.slane %v662_v28, 0 }
 0x20a   : > { %v674_v30 = vmul.f32 %v672_v29, %v669_v26  ;;  %v675_v31 = vmul.f32 %v672_v29, %v670_v27 }
 0x20c   : > { %1030 = vmatmul.msk.f32.vlgmr.msra.gmra.mxu0 %vm686_vm12, %v674_v30  ;;  %1031 = vmatmul.msk.f32.vlgmr.msra.gmra.mxu2 %vm686_vm12, %v675_v31 }
 0x289   : > { %v710_v41 = vpop.f32.mrf.mxu0 }
 0x28a   : > { %v711_v42 = vadd.f32 %v1209_v37, %v710_v41 }
 0x28c   : > { %v718_v44 = vmul.f32 %v1210_v39, %v711_v42 }
 0x28e   : > { %v1032_v45 = vmul.f32 -1.442695, %v718_v44 }
 0x28f   : > { %v713_v46 = vpop.f32.mrf.mxu2 }
 0x290   : > { %1214 = vpow2.f32 %v1032_v45  ;;  %v714_v47 = vadd.f32 %v1209_v37, %v713_v46 }
 0x292   : > { %v719_v48 = vmul.f32 %v1210_v39, %v714_v47 }
 0x294   : > { %v1033_v49 = vmul.f32 -1.442695, %v719_v48 }
 0x296   : > { %v1215_v50 = vpop.eup %1214  ;;  %1216 = vpow2.f32 %v1033_v49 }
 0x297   : > { %v726_v51 = vadd.f32 1.0, %v1215_v50 }
 0x299   : > { %1218 = vrcp.f32 %v726_v51  ;;  %v739_v56 = vand.u32 2147483648, %v726_v51  ;;  %vm733_vm13 = vweird.f32 %v726_v51  ;;  %v737_v58 = vand.u32 2147483647, %v726_v51 }
 0x29b   : > { %v740_v61 = vor.u32 1.1754944e-38, %v739_v56  ;;  %vm738_vm0 = vcmp.eq.f32.partialorder %v737_v58, 8.507059e+37 }
 0x29c   : > { %v1217_v52 = vpop.eup %1216 }
 0x29d   : > { %v727_v53 = vadd.f32 1.0, %v1217_v52 }
 0x29f   : > { %v1219_v54 = vpop.eup %1218  ;;  %1220 = vrcp.f32 %v727_v53  ;;  %v754_v3 = vand.u32 2147483648, %v727_v53  ;;  %v752_v6 = vand.u32 2147483647, %v727_v53  ;;  %vm748_vm2 = vweird.f32 %v727_v53 }
 0x2a0   : > { %v729_v55 = vmul.f32 %v1219_v54, %v726_v51  ;;  %vm734_vm14 = vweird.f32 %v1219_v54 }
 0x2a1   : > { %vm735_vm15 = vmor %vm733_vm13, %vm734_vm14  ;;  %v755_v8 = vor.u32 1.1754944e-38, %v754_v3  ;;  %vm753_vm4 = vcmp.eq.f32.partialorder %v752_v6, 8.507059e+37 }
 0x2a2   : > { %v730_v57 = vsub.f32 1.0, %v729_v55 }
 0x2a4   : > { %v731_v59 = vmul.f32 %v1219_v54, %v730_v57 }
 0x2a5   : > { %v1221_v60 = vpop.eup %1220 }
 0x2a6   : > { %v732_v62 = vadd.f32 %v1219_v54, %v731_v59  ;;  %v744_v63 = vmul.f32 %v1221_v60, %v727_v53  ;;  %vm749_vm1 = vweird.f32 %v1221_v60 }
 0x2a7   : > { %vm750_vm3 = vmor %vm748_vm2, %vm749_vm1 }
 0x2a8   : > { %v736_v0 = vsel %vm735_vm15, %v1219_v54, %v732_v62  ;;  %v745_v1 = vsub.f32 1.0, %v744_v63 }
 0x2a9   : > { %v741_v2 = vsel %vm738_vm0, %v740_v61, %v736_v0 }
 0x2aa   : > { %v758_v4 = vmul.f32 %v741_v2, %v711_v42  ;;  %v746_v5 = vmul.f32 %v1221_v60, %v745_v1 }
 0x2ac   : > { %760 = vst.msk [vmem:[%s1640_s11] sm:$0xff] %vm686_vm12, %v758_v4  ;;  %v747_v7 = vadd.f32 %v1221_v60, %v746_v5  ;;  %1034 = vmatmul.msk.f32.vlgmr.msra.gmra.mxu1 %vm686_vm12, %v758_v4 }
 0x2ae   : > { %v751_v9 = vsel %vm750_vm3, %v1221_v60, %v747_v7 }
 0x2af   : > { %v756_v10 = vsel %vm753_vm4, %v755_v8, %v751_v9 }
 0x2b0   : > { %v759_v11 = vmul.f32 %v756_v10, %v714_v47 }
 0x2b2   : > { %761 = vst.msk [vmem:[%s1640_s11 + $0x8] sm:$0xff] %vm686_vm12, %v759_v11  ;;  %1035 = vmatmul.msk.f32.vlgmr.msra.gmra.mxu3 %vm686_vm12, %v759_v11 }
 0x329   : > { %v797_v13 = vpop.f32.mrf.mxu1 }
 0x32a   : > { %v798_v14 = vadd.f32 %v1211_v12, %v797_v13 }
 0x332   : > { %806 = sbr.rel (%p1036_p9) target bundleno = 826 (0x33a), region = 72 }
 0x335   : > { %v800_v15 = vpop.f32.mrf.mxu3 }
 0x336   : > { %v801_v16 = vadd.f32 %v1211_v12, %v800_v15 }
 0x337   : > { %v1323_v17 = vmov 0.0  }
 0x338   : > { %807 = vst [vmem:[#allocation7] sm:$0x1] %v1323_v17 }
 0x339   : > { %808 = vst [vmem:[#allocation8] sm:$0x1] %v1323_v17 }
 0x33a PF: > { %v810_v18 = vadd.f32 %v801_v16, %v798_v14  ;;  %v820_v19 = vmul.f32 %v798_v14, %v798_v14  ;;  %v821_v20 = vmul.f32 %v801_v16, %v801_v16 }
 0x33c   : > { %v811_v21 = vrot.slane %v810_v18, 4  ;;  %v822_v22 = vadd.f32 %v821_v20, %v820_v19 }
 0x33e   : > { %v812_v23 = vadd.f32 %v811_v21, %v810_v18  ;;  %v823_v24 = vrot.slane %v822_v22, 4 }
 0x33f   : > { %v809_v31 = vld [vmem:[#allocation7] sm:$0x1] }
 0x340   : > { %v813_v25 = vrot.slane %v812_v23, 2  ;;  %v824_v26 = vadd.f32 %v823_v24, %v822_v22  ;;  %v819_v34 = vld [vmem:[#allocation8] sm:$0x1] }
 0x342   : > { %v814_v27 = vadd.f32 %v813_v25, %v812_v23  ;;  %v825_v28 = vrot.slane %v824_v26, 2 }
 0x344   : > { %v815_v29 = vrot.slane %v814_v27, 1  ;;  %v826_v30 = vadd.f32 %v825_v28, %v824_v26 }
 0x346   : > { %v816_v32 = vadd.f32 %v815_v29, %v814_v27  ;;  %v827_v33 = vrot.slane %v826_v30, 1 }
 0x348   : > { %v817_v35 = vadd.f32 %v816_v32, %v809_v31  ;;  %v828_v36 = vadd.f32 %v827_v33, %v826_v30 }
 0x34a   : > { %818 = vst [vmem:[#allocation7] sm:$0x1] %v817_v35  ;;  %v829_v37 = vadd.f32 %v828_v36, %v819_v34 }
 0x34c   : > { %830 = vst [vmem:[#allocation8] sm:$0x1] %v829_v37 }
 0x34d PF: > { %p1037_p10 = scmp.ne.s32.totalorder %s1307_s28, 3 }
 0x34e   : > { %s853_s13 = scalar_lea.vmem (!%p1037_p10), [#allocation2], %s1442_s22 }
 0x34f   : > { %834 = sbr.rel (%p1037_p10) target bundleno = 1002 (0x3ea), region = 76 }
 0x354   : > { %v864_v38 = vld [vmem:[%s1768_s5 + $0x38] sm:$0xff]  ;;  %v863_v39 = vld [vmem:[%s1768_s5 + $0x30] sm:$0xff]  ;;  %v862_v40 = vld [vmem:[%s1768_s5 + $0x28] sm:$0xff]  ;;  %vm868_vm5 = vcmask 523264  }
 0x355   : > { %883 = vmatpush.msra.mxu0 %v864_v38  ;;  %1103 = vmatpush.msra.mxu1 %v864_v38  ;;  %v861_v41 = vld [vmem:[%s1768_s5 + $0x20] sm:$0xff]  ;;  %v860_v42 = vld [vmem:[%s1768_s5 + $0x18] sm:$0xff]  ;;  %v859_v43 = vld [vmem:[%s1768_s5 + $0x10] sm:$0xff] }
 0x356   : > { %v858_v44 = vld [vmem:[%s1768_s5 + $0x8] sm:$0xff]  ;;  %v857_v45 = vld [vmem:[%s1768_s5] sm:$0xff] }
 0x357   : > { %884 = vmatpush.msra.mxu0 %v863_v39  ;;  %1104 = vmatpush.msra.mxu1 %v863_v39  ;;  %v854_v46 = vld [vmem:[%s853_s13] sm:$0xff]  ;;  %v855_v47 = vld [vmem:[%s853_s13 + $0x8] sm:$0xff] }
 0x358   : > { %v835_v48 = vld [vmem:[#allocation7] sm:$0x1]  ;;  %v837_v50 = vld [vmem:[#allocation8] sm:$0x1]  ;;  %v1222_v62 = vld [vmem:[%s1769_s6] ss:$0 sm:$0xff] }
 0x359   : > { %885 = vmatpush.msra.mxu0 %v862_v40  ;;  %1105 = vmatpush.msra.mxu1 %v862_v40  ;;  %v836_v49 = vmul.f32 0.015625, %v835_v48  ;;  %v838_v51 = vmul.f32 0.015625, %v837_v50 }
 0x35b   : > { %886 = vmatpush.msra.mxu0 %v861_v41  ;;  %1106 = vmatpush.msra.mxu1 %v861_v41  ;;  %v839_v52 = vmul.f32 %v836_v49, %v836_v49  ;;  %v899_v0 = vperm.slane %v836_v49, 0 }
 0x35d   : > { %887 = vmatpush.msra.mxu0 %v860_v42  ;;  %1107 = vmatpush.msra.mxu1 %v860_v42  ;;  %v840_v53 = vsub.f32 %v838_v51, %v839_v52 }
 0x35f   : > { %888 = vmatpush.msra.mxu0 %v859_v43  ;;  %1108 = vmatpush.msra.mxu1 %v859_v43  ;;  %v841_v54 = vmax.f32 %v840_v53, 0.0 }
 0x361   : > { %889 = vmatpush.msra.mxu0 %v858_v44  ;;  %1109 = vmatpush.msra.mxu1 %v858_v44  ;;  %v842_v55 = vadd.f32 1e-05, %v841_v54 }
 0x363   : > { %890 = vmatpush.msra.mxu0 %v857_v45  ;;  %1110 = vmatpush.msra.mxu1 %v857_v45  ;;  %1223 = vrsqrt.f32 %v842_v55  ;;  %vm849_vm6 = vweird.f32 %v842_v55 }
 0x364   : > { %1038 = vmatmul.msk.f32.vlgmr.msra.gmra.mxu0 %vm868_vm5, %v854_v46  ;;  %1039 = vmatmul.msk.f32.vlgmr.msra.gmra.mxu1 %vm868_vm5, %v855_v47 }
 0x369   : > { %v1224_v56 = vpop.eup %1223 }
 0x36a   : > { %v844_v57 = vmul.f32 %v1224_v56, %v842_v55  ;;  %vm850_vm7 = vweird.f32 %v1224_v56 }
 0x36b   : > { %vm851_vm8 = vmor %vm849_vm6, %vm850_vm7 }
 0x36c   : > { %v845_v58 = vmul.f32 %v1224_v56, %v844_v57 }
 0x36e   : > { %v846_v59 = vmul.f32 0.5, %v845_v58 }
 0x370   : > { %v847_v60 = vsub.f32 1.5, %v846_v59 }
 0x372   : > { %v848_v61 = vmul.f32 %v1224_v56, %v847_v60 }
 0x374   : > { %v852_v63 = vsel %vm851_vm8, %v1224_v56, %v848_v61 }
 0x375   : > { %v904_v4 = vperm.slane %v852_v63, 0 }
 0x3e1   : > { %v892_v1 = vpop.f32.mrf.mxu0  ;;  %v895_v2 = vpop.f32.mrf.mxu1 }
 0x3e2   : > { %v893_v3 = vadd.f32 %v1222_v62, %v892_v1  ;;  %v896_v5 = vadd.f32 %v1222_v62, %v895_v2 }
 0x3e4   : > { %v901_v6 = vsub.f32 %v893_v3, %v899_v0  ;;  %v902_v7 = vsub.f32 %v896_v5, %v899_v0 }
 0x3e6   : > { %v906_v8 = vmul.f32 %v904_v4, %v901_v6  ;;  %v907_v9 = vmul.f32 %v904_v4, %v902_v7 }
 0x3e8   : > { %908 = vst [vmem:[%s1450_s18] sm:$0xff] %v906_v8 }
 0x3e9   : > { %909 = vst [vmem:[%s1450_s18 + $0x8] sm:$0xff] %v907_v9 }
 0x3ea PF: > { %p918_p11 = scmp.eq.s32.totalorder %s1307_s28, 3  ;;  %s925_s30 = sshll.u32 %s1450_s18, 4  ;;  %s926_s30 = int_to_ptr.vmem [resolvable:$true] %s925_s30 }
 0x3eb   : > { %s1780_s12 = sand.u32 1, %s1295_s25  }
 0x3ec   : > { %s1798_s27 = smov (!%p918_p11, %s1303_s27), 0  ;;  %s911_s21 = scalar_lea.sflag [#allocation10], %s1780_s12 }
 0x3ed   : > { %s1046_s10 = sshll.u32 %s1798_s27, 4  ;;  %s1245_s27 = scalar_lea.hbm %s1770_s7, 64 }
 0x3ee   : > { %s924_s11 = scalar_lea.hbm %s1770_s7, %s1046_s10 }
 0x3ef   : > { %s927_s9 = sshll.u32 %s924_s11, 4  ;;  %s928_s9 = int_to_ptr.hbm [resolvable:$true] %s927_s9 }
 0x3f0   : > { %s1239_s17 = sshra.s32 %s928_s9, 4  ;;  %s1240_s17 = int_to_ptr.hbm [resolvable:$true] %s1239_s17 }
 0x3f1   : > { %s1241_s13 = scalar_lea.hbm %s1240_s17, 16  ;;  %p1246_p1 = scmp.lt.s32.totalorder %s1240_s17, %s1770_s7 }
 0x3f2   : > { %p1242_p12 = scmp.ne.s32.totalorder %s1240_s17, %s1241_s13  ;;  %p1247_p2 = scmp.lt.s32.totalorder %s1245_s27, %s1241_s13 }
 0x3f4   : > { %p1243_p13 = pnand %p1242_p12, %p1421_p7  ;;  %p1248_p3 = por %p1247_p2, %p1246_p1 }
 0x3f6   : > { %p1244_p0 = pneg %p1243_p13 }
 0x3f8   : > { %p1249_p4 = pnand %p1248_p3, %p1244_p0 }
 0x3fa   : > { %1252 = shalt.err (!%p1249_p4)
}
 0x3fb   : > { %s1324_s10 = smov 128   ;;  %s1325_s20 = smov 8  }
 0x3fc   : > { %1111 = dma.vmem_to_hbm [thread:$0]  (%p1421_p7), %s926_s30, 256, %s928_s9, %s911_s21, %s1324_s10, %s1324_s10, %s1325_s20  }
 0x3fd PF: > { %p1117_p5 = scmp.ge.s32.totalorder %s1319_s8, 2  ;;  %s942_s23 = sand.u32 1, %s1291_s24  }
 0x3fe   : > { %s943_s11 = scalar_lea.sflag [#allocation10], %s942_s23 }
 0x3ff   : > { %p1114_p6 = pnand %p1117_p5, %p1425_p8 }
 0x401   : > { %p1115_p9 = pneg %p1114_p6 }
 0x403   : > { %1286 = dma.done.wait (%p1115_p9), %s943_s11, 256  }
 0x404   : > { %1288 = vsyncadd (%p1115_p9), %s943_s11, 4294967040  ;;  %s20_s8 = sadd.s32 1, %s1319_s8   ;;  %s1781_s28 = sld [smem:[#allocation12_spill]] }
 0x405   : > { %p17_p10 = scmp.ge.s32.totalorder %s20_s8, 18   ;;  %s1782_s14 = sld [smem:[#allocation13_spill]] }
 0x406   : > { %s1783_s30 = sld [smem:[#allocation14_spill]]  ;;  %s1784_s24 = smov %s1295_s25 }
 0x407   : > { %s1785_s25 = smov %s1299_s26  ;;  %s1786_s26 = smov %s1435_s19 }
 0x408   : > { %s1787_s27 = smov %s1311_s29  ;;  %19 = sbr.rel (!%p17_p10) target bundleno = 5 (0x5), region = 115 }
 0x40b   : > { %s1788_s29 = smov %s1782_s14 }
 0x40d   :  { %949 = vsyncpa [#allocation10], 1 }
 0x40e   :  { %951 = vsyncpa [#allocation10 + $0x1], 1 }

</bundles_post_ra>
